<compile_context>
chip_gen: v5e
topology: v5e:2x2
jax: 0.10.0
libtpu: 0.0.40
codegen_flags: <defaults>
</compile_context>

<pallas_src>
import numpy as np
import jax
import jax.numpy as jnp
from jax import lax
from jax.experimental import pallas as pl
from jax.experimental.pallas import tpu as pltpu

_VMEM = pl.BlockSpec(memory_space=pltpu.MemorySpace.VMEM)
_NEG = -1e30  # mask fill for the per-edge softmax over nodes


def _leaky(v):
    return jnp.where(v >= 0, v, 0.2 * v)


# ----------------------------- fused Pallas kernel -----------------------------

def _make_hgat_kernel(n, d_in, d_model, ep, heads1, heads2):
    f32 = jnp.float32
    bf16 = jnp.bfloat16
    F = d_model

    def hconv(h, a_bf, mask, binv_col, dinv, wt, att_src, att_dst, heads):
        """HypergraphConv(use_attention, attention_mode='node', concat=False), no bias."""
        hb = h.astype(bf16)
        x_lin = jnp.dot(hb, wt, preferred_element_type=f32)                # (N, H*F)
        x_lin_bf = x_lin.astype(bf16)                                      # cast once, reused
        # hyperedge features, reassociated: (Aᵀ h) W == Aᵀ (h W)  (drops the (Ep,d)x(d,H*F) matmul)
        xe_lin_bf = lax.dot_general(a_bf, x_lin_bf, (((0,), (0,)), ((), ())),
                                    preferred_element_type=f32).astype(bf16)   # (Ep, H*F)
        # all-head attention logits in two matmuls (block-diagonal att built host-side)
        alpha_v = jnp.dot(x_lin_bf, att_src, preferred_element_type=f32)   # (N, H)
        alpha_e = lax.dot_general(att_dst, xe_lin_bf, (((1,), (1,)), ((), ())),
                                  preferred_element_type=f32)              # (H, Ep)

        acc = jnp.zeros((n, F), f32)
        for hd in range(heads):                                            # heads <= 4, unrolled
            xh_bf = x_lin_bf[:, hd * F:(hd + 1) * F]                       # (N, F) bf16
            logits = _leaky(alpha_v[:, hd:hd + 1] + alpha_e[hd:hd + 1, :])  # (N, Ep)
            masked = jnp.where(mask, logits, _NEG)
            mmax = jnp.max(masked, axis=0, keepdims=True)                  # (1, Ep)
            e = jnp.where(mask, jnp.exp(masked - mmax), 0.0)
            inv_den = 1.0 / jnp.maximum(jnp.sum(e, axis=0, keepdims=True), 1e-30)
            wts_bf = (e * inv_den).astype(bf16)   # per-edge softmax over nodes; cast once
            # TODO(synk): attention dropout(0.2) is identity in eval mode.
            # node -> edge:  m_e = sum_v alpha[v,e] * x[v],   then scale by 1/|edge|
            m_e = lax.dot_general(wts_bf, xh_bf, (((0,), (0,)), ((), ())),
                                  preferred_element_type=f32)              # (Ep, F)
            # edge -> node:  out[v] = sum_e alpha[v,e] * (binv[e] * m_e)
            acc = acc + jnp.dot(wts_bf, (m_e * binv_col).astype(bf16),
                                preferred_element_type=f32)                # (N, F)
        # concat=False -> head mean; D^-1 applied once, outside the head loop
        return acc * (dinv * f32(1.0 / heads))

    def kernel(src_ref, a_ref, binvc_ref, dinv_ref,
               w1t_ref, w2t_ref,
               h1_wt_ref, h1_asrc_ref, h1_adst_ref,
               h2_wt_ref, h2_asrc_ref, h2_adst_ref,
               vdm_ref, vdin_ref, o_ref):
        src = src_ref[...]                         # (N, d_in) f32
        a_bf = a_ref[...]                          # (N, Ep) bf16 0/1 incidence
        mask = a_bf > 0                            # hoisted once, shared by both hconv stages
        binv_col = binvc_ref[...]                  # (Ep, 1) 1/|edge|  (0 on padded edges)
        dinv = dinv_ref[...]                       # (N, 1)  1/deg(node)
        vdm = vdm_ref[...]                         # (9, d_model) packed per-feature vectors
        vdin = vdin_ref[...]                       # (3, d_in)

        # --- linear1 + leaky_relu + [dropout1=id] + bn1 ---
        y = jnp.dot(src.astype(bf16), w1t_ref[...], preferred_element_type=f32) + vdm[0:1]
        h = _leaky(y) * vdm[1:2] + vdm[2:3]

        # --- hatt1 (4 heads) + residual + [dropout2=id] + bn2 ---
        x2 = hconv(h, a_bf, mask, binv_col, dinv, h1_wt_ref[...],
                   h1_asrc_ref[...], h1_adst_ref[...], heads1) + vdm[3:4]
        h = (h + x2) * vdm[4:5] + vdm[5:6]

        # --- hatt2 (1 head) + residual + [dropout3=id] + bn3 ---
        x2 = hconv(h, a_bf, mask, binv_col, dinv, h2_wt_ref[...],
                   h2_asrc_ref[...], h2_adst_ref[...], heads2) + vdm[6:7]
        h = (h + x2) * vdm[7:8] + vdm[8:9]

        # --- linear2 + leaky_relu + residual(src) + [dropout4=id] + bn4 ---
        y = jnp.dot(h.astype(bf16), w2t_ref[...], preferred_element_type=f32) + vdin[0:1]
        o_ref[...] = (src + _leaky(y)) * vdin[1:2] + vdin[2:3]

    return kernel


# ----------------------------- wrapper ------------------------------------

def hgat_forward(x, graph, kp):
    """Jittable forward.  x: (N, L, d_model); graph/kp: precomputed device arrays."""
    n, seq_l, d_model = x.shape
    d_in = seq_l * d_model
    ep = graph["a"].shape[1]
    heads1 = kp["h1_adst"].shape[0]
    heads2 = kp["h2_adst"].shape[0]
    src = x.astype(jnp.float32).reshape(n, d_in)

    args = (src, graph["a"], graph["binv_col"], graph["dinv"],
            kp["w1t"], kp["w2t"],
            kp["h1_wt"], kp["h1_asrc"], kp["h1_adst"],
            kp["h2_wt"], kp["h2_asrc"], kp["h2_adst"],
            kp["vec_dm"], kp["vec_din"])

    def stage_flops(heads):
        hf = heads * d_model
        return (2 * n * d_model * hf + 2 * ep * n * hf + 2 * n * hf * heads
                + 2 * heads * hf * ep + heads * 4 * n * ep * d_model)

    flops = 4 * n * d_in * d_model + stage_flops(heads1) + stage_flops(heads2)
    io_bytes = sum(int(np.prod(a.shape)) * a.dtype.itemsize for a in args) + n * d_in * 4
    vmem_limit = int(min(max(32 * 1024 * 1024, 8 * io_bytes), 48 * 1024 * 1024))

    kernel = _make_hgat_kernel(n, d_in, d_model, ep, heads1, heads2)
    out = pl.pallas_call(
        kernel,
        out_shape=jax.ShapeDtypeStruct((n, d_in), jnp.float32),
        in_specs=[_VMEM] * len(args),
        out_specs=_VMEM,
        compiler_params=pltpu.CompilerParams(vmem_limit_bytes=vmem_limit),
        cost_estimate=pl.CostEstimate(
            flops=int(flops),
            transcendentals=int((heads1 + heads2) * n * ep),
            bytes_accessed=int(io_bytes)),
    )(*args)
    return out.reshape(n, seq_l, d_model)


# ----------------------------- one-time host prep ---------------------------

def prepare_graph(hyperedge_index, num_nodes):
    """Dense incidence tensors; depends only on the hypergraph, computed once."""
    hi = np.asarray(hyperedge_index)
    num_edges = int(hi[1].max()) + 1
    assert int(hi[0].max()) < num_nodes, "node index out of range"
    # no duplicate (node, edge) pairs: counts == 0/1 incidence, so the single bf16 `a`
    # slab serves both as the hyperedge_attr adjacency and the attention mask.
    pair_ids = hi[0].astype(np.int64) * num_edges + hi[1].astype(np.int64)
    assert len(np.unique(pair_ids)) == hi.shape[1], \
        "duplicate (node, edge) pairs unsupported (counts would diverge from 0/1 mask)"

    # pad hyperedge axis to a multiple of 128 lanes; padded edges are inert (a=0, binv=0)
    ep = ((max(num_edges, 1) + 127) // 128) * 128
    a = np.zeros((num_nodes, ep), np.float32)
    a[hi[0], hi[1]] = 1.0

    deg_n = np.zeros(num_nodes, np.float32); np.add.at(deg_n, hi[0], 1.0)
    deg_e = np.zeros(ep, np.float32);        np.add.at(deg_e, hi[1], 1.0)
    dinv = np.where(deg_n > 0, 1.0 / np.maximum(deg_n, 1e-12), 0.0).astype(np.float32)
    binv = np.where(deg_e > 0, 1.0 / np.maximum(deg_e, 1e-12), 0.0).astype(np.float32)

    return {"a": jnp.asarray(a, jnp.bfloat16),
            "binv_col": jnp.asarray(binv.reshape(ep, 1), jnp.float32),
            "dinv": jnp.asarray(dinv.reshape(num_nodes, 1), jnp.float32)}


def init_params(key, d_in, d_model):
    ks = jax.random.split(key, 6)

    def glorot(k, shape):
        fan_out, fan_in = shape
        lim = float(np.sqrt(6.0 / (fan_in + fan_out)))
        return jax.random.uniform(k, shape, jnp.float32, -lim, lim)

    def bn(c):
        return (jnp.ones(c, jnp.float32), jnp.zeros(c, jnp.float32),
                jnp.zeros(c, jnp.float32), jnp.ones(c, jnp.float32))

    return {
        "w1": glorot(ks[0], (d_model, d_in)), "b1": jnp.zeros(d_model, jnp.float32),
        "w2": glorot(ks[1], (d_in, d_model)), "b2": jnp.zeros(d_in, jnp.float32),
        "hatt1_w": glorot(ks[2], (4 * d_model, d_model)),
        "hatt1_att": jax.random.normal(ks[3], (1, 4, 2 * d_model), jnp.float32) * 0.1,
        "hatt1_bias": jnp.zeros(d_model, jnp.float32),
        "hatt2_w": glorot(ks[4], (d_model, d_model)),
        "hatt2_att": jax.random.normal(ks[5], (1, 1, 2 * d_model), jnp.float32) * 0.1,
        "hatt2_bias": jnp.zeros(d_model, jnp.float32),
        "bn1": bn(d_model), "bn2": bn(d_model), "bn3": bn(d_model), "bn4": bn(d_model),
    }


def prepare_params(p, seq_l, eps=1e-5):
    """Pre-transpose weights (bf16), build block-diagonal att matrices, fold eval BN,
    and pack all (1, d) vectors into two arrays (fewer DMA descriptors)."""
    def bn_affine(bn):
        gamma, beta, mean, var = bn
        scale = gamma * lax.rsqrt(var + eps)
        return scale, beta - mean * scale

    def att_block_diag(att):                    # att: (H, 2F)
        att = np.asarray(att, np.float32)
        h, two_f = att.shape
        f = two_f // 2
        src = np.zeros((h * f, h), np.float32)  # x_lin @ src  -> (N, H)
        dst = np.zeros((h, h * f), np.float32)  # dst . xe_lin -> (H, Ep)
        for i in range(h):
            src[i * f:(i + 1) * f, i] = att[i, :f]
            dst[i, i * f:(i + 1) * f] = att[i, f:]
        return jnp.asarray(src, jnp.bfloat16), jnp.asarray(dst, jnp.bfloat16)

    s1, t1 = bn_affine(p["bn1"]); s2, t2 = bn_affine(p["bn2"])
    s3, t3 = bn_affine(p["bn3"]); s4, t4 = bn_affine(p["bn4"])
    h1_asrc, h1_adst = att_block_diag(p["hatt1_att"][0])
    h2_asrc, h2_adst = att_block_diag(p["hatt2_att"][0])
    bf = jnp.bfloat16

    # packed per-feature vectors (rows: b1, bn1_s, bn1_t, h1_bias, bn2_s, bn2_t,
    #                                   h2_bias, bn3_s, bn3_t)
    vec_dm = jnp.stack([p["b1"], s1, t1,
                        p["hatt1_bias"], s2, t2,
                        p["hatt2_bias"], s3, t3], axis=0).astype(jnp.float32)
    # bn4 = Transpose(1,2) -> BatchNorm1d(d_model) -> Transpose(1,2): per-feature affine
    # on the last axis; tile over L so it applies to the flattened (N, L*d) view.
    vec_din = jnp.stack([p["b2"], jnp.tile(s4, seq_l), jnp.tile(t4, seq_l)],
                        axis=0).astype(jnp.float32)

    return {
        "w1t": p["w1"].T.astype(bf), "w2t": p["w2"].T.astype(bf),
        "h1_wt": p["hatt1_w"].T.astype(bf), "h1_asrc": h1_asrc, "h1_adst": h1_adst,
        "h2_wt": p["hatt2_w"].T.astype(bf), "h2_asrc": h2_asrc, "h2_adst": h2_adst,
        "vec_dm": vec_dm, "vec_din": vec_din,
    }


# ----------------------------- main -----------------------------------------

if __name__ == "__main__":
    key = jax.random.PRNGKey(0)
    N, L, d_model = 8, 2, 128          # 8 nodes (batch), d_in = 256 — lane-dense everywhere
    d_in = L * d_model
    assert N % 8 == 0, "node count kept a multiple of 8 for TPU sublane alignment"

    k_x, k_p = jax.random.split(key)
    x = jax.random.normal(k_x, (N, L, d_model), jnp.float32)

    # 3 hyperedges over the 8 nodes
    hyperedge_index = np.array(
        [[0, 1, 2, 2, 3, 4, 5, 6, 7],
         [0, 0, 0, 1, 1, 1, 2, 2, 2]], dtype=np.int32)

    raw_params = init_params(k_p, d_in, d_model)
    kp = prepare_params(raw_params, L)              # once: transpose / bf16 / fold BN / pack
    graph = prepare_graph(hyperedge_index, N)       # once: dense incidence, padded to 128

    fwd = jax.jit(hgat_forward)
    out = jax.block_until_ready(fwd(x, graph, kp))

    assert out.shape == (N, L, d_model)
    assert np.isfinite(np.asarray(out)).all()
    print("KERNEL_OK")
</pallas_src>

<mosaic_0001>
module attributes {stable_mosaic.version = 11 : i64} {
  func.func @kernel(%arg0: memref<8x256xf32, #tpu.memory_space<vmem>>, %arg1: memref<8x128xbf16, #tpu.memory_space<vmem>>, %arg2: memref<128x1xf32, #tpu.memory_space<vmem>>, %arg3: memref<8x1xf32, #tpu.memory_space<vmem>>, %arg4: memref<256x128xbf16, #tpu.memory_space<vmem>>, %arg5: memref<128x256xbf16, #tpu.memory_space<vmem>>, %arg6: memref<128x512xbf16, #tpu.memory_space<vmem>>, %arg7: memref<512x4xbf16, #tpu.memory_space<vmem>>, %arg8: memref<4x512xbf16, #tpu.memory_space<vmem>>, %arg9: memref<128x128xbf16, #tpu.memory_space<vmem>>, %arg10: memref<128x1xbf16, #tpu.memory_space<vmem>>, %arg11: memref<1x128xbf16, #tpu.memory_space<vmem>>, %arg12: memref<9x128xf32, #tpu.memory_space<vmem>>, %arg13: memref<3x256xf32, #tpu.memory_space<vmem>>, %arg14: memref<8x256xf32, #tpu.memory_space<vmem>>) attributes {dimension_semantics = [], scalar_prefetch = 0 : i64, scratch_operands = 0 : i64, tpu.core_type = #tpu.core_type<tc>} {
    %c0 = arith.constant 0 : index
    %c0_0 = arith.constant 0 : index
    %0 = vector.load %arg0[%c0, %c0_0] : memref<8x256xf32, #tpu.memory_space<vmem>>, vector<8x256xf32>
    %c0_1 = arith.constant 0 : index
    %c0_2 = arith.constant 0 : index
    %1 = vector.load %arg1[%c0_1, %c0_2] : memref<8x128xbf16, #tpu.memory_space<vmem>>, vector<8x128xbf16>
    %cst = arith.constant 0.000000e+00 : bf16
    %2 = vector.broadcast %cst : bf16 to vector<8x128xbf16>
    %3 = arith.cmpf ogt, %1, %2 : vector<8x128xbf16>
    %c0_3 = arith.constant 0 : index
    %c0_4 = arith.constant 0 : index
    %4 = vector.load %arg2[%c0_3, %c0_4] : memref<128x1xf32, #tpu.memory_space<vmem>>, vector<128x1xf32>
    %c0_5 = arith.constant 0 : index
    %c0_6 = arith.constant 0 : index
    %5 = vector.load %arg3[%c0_5, %c0_6] : memref<8x1xf32, #tpu.memory_space<vmem>>, vector<8x1xf32>
    %c0_7 = arith.constant 0 : index
    %c0_8 = arith.constant 0 : index
    %6 = vector.load %arg12[%c0_7, %c0_8] : memref<9x128xf32, #tpu.memory_space<vmem>>, vector<9x128xf32>
    %c0_9 = arith.constant 0 : index
    %c0_10 = arith.constant 0 : index
    %7 = vector.load %arg13[%c0_9, %c0_10] : memref<3x256xf32, #tpu.memory_space<vmem>>, vector<3x256xf32>
    %8 = arith.truncf %0 : vector<8x256xf32> to vector<8x256xbf16>
    %c0_11 = arith.constant 0 : index
    %c0_12 = arith.constant 0 : index
    %9 = vector.load %arg4[%c0_11, %c0_12] : memref<256x128xbf16, #tpu.memory_space<vmem>>, vector<256x128xbf16>
    %cst_13 = arith.constant dense<0.000000e+00> : vector<8x128xf32>
    %10 = tpu.matmul %8, %9, %cst_13 {dimension_numbers = #tpu.dot_dimension_numbers<[1], [0], [0], [1], [0, 0, 1, 1], [], []>} : vector<8x256xbf16>, vector<256x128xbf16>, vector<8x128xf32> -> vector<8x128xf32>
    %11 = vector.extract_strided_slice %6 {offsets = [0, 0], sizes = [1, 128], strides = [1, 1]} : vector<9x128xf32> to vector<1x128xf32>
    %12 = vector.broadcast %11 : vector<1x128xf32> to vector<8x128xf32>
    %13 = arith.addf %10, %12 : vector<8x128xf32>
    %cst_14 = arith.constant 0.000000e+00 : f32
    %14 = vector.broadcast %cst_14 : f32 to vector<8x128xf32>
    %15 = arith.cmpf oge, %13, %14 : vector<8x128xf32>
    %cst_15 = arith.constant 2.000000e-01 : f32
    %16 = vector.broadcast %cst_15 : f32 to vector<8x128xf32>
    %17 = arith.mulf %16, %13 : vector<8x128xf32>
    %18 = arith.select %15, %13, %17 : vector<8x128xi1>, vector<8x128xf32>
    %19 = vector.extract_strided_slice %6 {offsets = [1, 0], sizes = [1, 128], strides = [1, 1]} : vector<9x128xf32> to vector<1x128xf32>
    %20 = vector.broadcast %19 : vector<1x128xf32> to vector<8x128xf32>
    %21 = arith.mulf %18, %20 : vector<8x128xf32>
    %22 = vector.extract_strided_slice %6 {offsets = [2, 0], sizes = [1, 128], strides = [1, 1]} : vector<9x128xf32> to vector<1x128xf32>
    %23 = vector.broadcast %22 : vector<1x128xf32> to vector<8x128xf32>
    %24 = arith.addf %21, %23 : vector<8x128xf32>
    %c0_16 = arith.constant 0 : index
    %c0_17 = arith.constant 0 : index
    %25 = vector.load %arg6[%c0_16, %c0_17] : memref<128x512xbf16, #tpu.memory_space<vmem>>, vector<128x512xbf16>
    %c0_18 = arith.constant 0 : index
    %c0_19 = arith.constant 0 : index
    %26 = vector.load %arg7[%c0_18, %c0_19] : memref<512x4xbf16, #tpu.memory_space<vmem>>, vector<512x4xbf16>
    %c0_20 = arith.constant 0 : index
    %c0_21 = arith.constant 0 : index
    %27 = vector.load %arg8[%c0_20, %c0_21] : memref<4x512xbf16, #tpu.memory_space<vmem>>, vector<4x512xbf16>
    %28 = arith.truncf %24 : vector<8x128xf32> to vector<8x128xbf16>
    %cst_22 = arith.constant dense<0.000000e+00> : vector<8x512xf32>
    %29 = tpu.matmul %28, %25, %cst_22 {dimension_numbers = #tpu.dot_dimension_numbers<[1], [0], [0], [1], [0, 0, 1, 1], [], []>} : vector<8x128xbf16>, vector<128x512xbf16>, vector<8x512xf32> -> vector<8x512xf32>
    %30 = arith.truncf %29 : vector<8x512xf32> to vector<8x512xbf16>
    %cst_23 = arith.constant dense<0.000000e+00> : vector<128x512xf32>
    %31 = tpu.matmul %1, %30, %cst_23 {dimension_numbers = #tpu.dot_dimension_numbers<[0], [0], [1], [1], [0, 1, 1, 1], [], []>} : vector<8x128xbf16>, vector<8x512xbf16>, vector<128x512xf32> -> vector<128x512xf32>
    %32 = arith.truncf %31 : vector<128x512xf32> to vector<128x512xbf16>
    %cst_24 = arith.constant dense<0.000000e+00> : vector<8x4xf32>
    %33 = tpu.matmul %30, %26, %cst_24 {dimension_numbers = #tpu.dot_dimension_numbers<[1], [0], [0], [1], [0, 0, 1, 1], [], []>} : vector<8x512xbf16>, vector<512x4xbf16>, vector<8x4xf32> -> vector<8x4xf32>
    %cst_25 = arith.constant dense<0.000000e+00> : vector<4x128xf32>
    %34 = tpu.matmul %27, %32, %cst_25 {dimension_numbers = #tpu.dot_dimension_numbers<[1], [1], [0], [0], [0, 0, 1, 0], [], []>} : vector<4x512xbf16>, vector<128x512xbf16>, vector<4x128xf32> -> vector<4x128xf32>
    %cst_26 = arith.constant 0.000000e+00 : f32
    %35 = vector.broadcast %cst_26 : f32 to vector<8x128xf32>
    %36 = vector.extract_strided_slice %30 {offsets = [0, 0], sizes = [8, 128], strides = [1, 1]} : vector<8x512xbf16> to vector<8x128xbf16>
    %37 = vector.extract_strided_slice %33 {offsets = [0, 0], sizes = [8, 1], strides = [1, 1]} : vector<8x4xf32> to vector<8x1xf32>
    %38 = vector.extract_strided_slice %34 {offsets = [0, 0], sizes = [1, 128], strides = [1, 1]} : vector<4x128xf32> to vector<1x128xf32>
    %39 = vector.broadcast %37 : vector<8x1xf32> to vector<8x128xf32>
    %40 = vector.broadcast %38 : vector<1x128xf32> to vector<8x128xf32>
    %41 = arith.addf %39, %40 : vector<8x128xf32>
    %cst_27 = arith.constant 0.000000e+00 : f32
    %42 = vector.broadcast %cst_27 : f32 to vector<8x128xf32>
    %43 = arith.cmpf oge, %41, %42 : vector<8x128xf32>
    %cst_28 = arith.constant 2.000000e-01 : f32
    %44 = vector.broadcast %cst_28 : f32 to vector<8x128xf32>
    %45 = arith.mulf %44, %41 : vector<8x128xf32>
    %46 = arith.select %43, %41, %45 : vector<8x128xi1>, vector<8x128xf32>
    %cst_29 = arith.constant -1.000000e+30 : f32
    %47 = vector.broadcast %cst_29 : f32 to vector<8x128xf32>
    %48 = arith.select %3, %46, %47 : vector<8x128xi1>, vector<8x128xf32>
    %cst_30 = arith.constant dense<0xFF800000> : vector<128xf32>
    %49 = vector.multi_reduction <maximumf>, %48, %cst_30 [0] : vector<8x128xf32> to vector<128xf32>
    %50 = vector.shape_cast %49 : vector<128xf32> to vector<1x128xf32>
    %51 = vector.broadcast %50 : vector<1x128xf32> to vector<8x128xf32>
    %52 = arith.subf %48, %51 : vector<8x128xf32>
    %53 = math.exp %52 : vector<8x128xf32>
    %cst_31 = arith.constant 0.000000e+00 : f32
    %54 = vector.broadcast %cst_31 : f32 to vector<8x128xf32>
    %55 = arith.select %3, %53, %54 : vector<8x128xi1>, vector<8x128xf32>
    %cst_32 = arith.constant dense<0.000000e+00> : vector<128xf32>
    %56 = vector.multi_reduction <add>, %55, %cst_32 [0] : vector<8x128xf32> to vector<128xf32>
    %57 = vector.shape_cast %56 : vector<128xf32> to vector<1x128xf32>
    %cst_33 = arith.constant 1.000000e-30 : f32
    %58 = vector.broadcast %cst_33 : f32 to vector<1x128xf32>
    %59 = arith.maximumf %57, %58 : vector<1x128xf32>
    %cst_34 = arith.constant 1.000000e+00 : f32
    %60 = vector.broadcast %cst_34 : f32 to vector<1x128xf32>
    %61 = arith.divf %60, %59 : vector<1x128xf32>
    %62 = vector.broadcast %61 : vector<1x128xf32> to vector<8x128xf32>
    %63 = arith.mulf %55, %62 : vector<8x128xf32>
    %64 = arith.truncf %63 : vector<8x128xf32> to vector<8x128xbf16>
    %cst_35 = arith.constant dense<0.000000e+00> : vector<128x128xf32>
    %65 = tpu.matmul %64, %36, %cst_35 {dimension_numbers = #tpu.dot_dimension_numbers<[0], [0], [1], [1], [0, 1, 1, 1], [], []>} : vector<8x128xbf16>, vector<8x128xbf16>, vector<128x128xf32> -> vector<128x128xf32>
    %66 = vector.broadcast %4 : vector<128x1xf32> to vector<128x128xf32>
    %67 = arith.mulf %65, %66 : vector<128x128xf32>
    %68 = arith.truncf %67 : vector<128x128xf32> to vector<128x128xbf16>
    %cst_36 = arith.constant dense<0.000000e+00> : vector<8x128xf32>
    %69 = tpu.matmul %64, %68, %cst_36 {dimension_numbers = #tpu.dot_dimension_numbers<[1], [0], [0], [1], [0, 0, 1, 1], [], []>} : vector<8x128xbf16>, vector<128x128xbf16>, vector<8x128xf32> -> vector<8x128xf32>
    %70 = arith.addf %35, %69 : vector<8x128xf32>
    %71 = vector.extract_strided_slice %30 {offsets = [0, 128], sizes = [8, 128], strides = [1, 1]} : vector<8x512xbf16> to vector<8x128xbf16>
    %72 = vector.extract_strided_slice %33 {offsets = [0, 1], sizes = [8, 1], strides = [1, 1]} : vector<8x4xf32> to vector<8x1xf32>
    %73 = vector.extract_strided_slice %34 {offsets = [1, 0], sizes = [1, 128], strides = [1, 1]} : vector<4x128xf32> to vector<1x128xf32>
    %74 = vector.broadcast %72 : vector<8x1xf32> to vector<8x128xf32>
    %75 = vector.broadcast %73 : vector<1x128xf32> to vector<8x128xf32>
    %76 = arith.addf %74, %75 : vector<8x128xf32>
    %cst_37 = arith.constant 0.000000e+00 : f32
    %77 = vector.broadcast %cst_37 : f32 to vector<8x128xf32>
    %78 = arith.cmpf oge, %76, %77 : vector<8x128xf32>
    %cst_38 = arith.constant 2.000000e-01 : f32
    %79 = vector.broadcast %cst_38 : f32 to vector<8x128xf32>
    %80 = arith.mulf %79, %76 : vector<8x128xf32>
    %81 = arith.select %78, %76, %80 : vector<8x128xi1>, vector<8x128xf32>
    %cst_39 = arith.constant -1.000000e+30 : f32
    %82 = vector.broadcast %cst_39 : f32 to vector<8x128xf32>
    %83 = arith.select %3, %81, %82 : vector<8x128xi1>, vector<8x128xf32>
    %cst_40 = arith.constant dense<0xFF800000> : vector<128xf32>
    %84 = vector.multi_reduction <maximumf>, %83, %cst_40 [0] : vector<8x128xf32> to vector<128xf32>
    %85 = vector.shape_cast %84 : vector<128xf32> to vector<1x128xf32>
    %86 = vector.broadcast %85 : vector<1x128xf32> to vector<8x128xf32>
    %87 = arith.subf %83, %86 : vector<8x128xf32>
    %88 = math.exp %87 : vector<8x128xf32>
    %cst_41 = arith.constant 0.000000e+00 : f32
    %89 = vector.broadcast %cst_41 : f32 to vector<8x128xf32>
    %90 = arith.select %3, %88, %89 : vector<8x128xi1>, vector<8x128xf32>
    %cst_42 = arith.constant dense<0.000000e+00> : vector<128xf32>
    %91 = vector.multi_reduction <add>, %90, %cst_42 [0] : vector<8x128xf32> to vector<128xf32>
    %92 = vector.shape_cast %91 : vector<128xf32> to vector<1x128xf32>
    %cst_43 = arith.constant 1.000000e-30 : f32
    %93 = vector.broadcast %cst_43 : f32 to vector<1x128xf32>
    %94 = arith.maximumf %92, %93 : vector<1x128xf32>
    %cst_44 = arith.constant 1.000000e+00 : f32
    %95 = vector.broadcast %cst_44 : f32 to vector<1x128xf32>
    %96 = arith.divf %95, %94 : vector<1x128xf32>
    %97 = vector.broadcast %96 : vector<1x128xf32> to vector<8x128xf32>
    %98 = arith.mulf %90, %97 : vector<8x128xf32>
    %99 = arith.truncf %98 : vector<8x128xf32> to vector<8x128xbf16>
    %cst_45 = arith.constant dense<0.000000e+00> : vector<128x128xf32>
    %100 = tpu.matmul %99, %71, %cst_45 {dimension_numbers = #tpu.dot_dimension_numbers<[0], [0], [1], [1], [0, 1, 1, 1], [], []>} : vector<8x128xbf16>, vector<8x128xbf16>, vector<128x128xf32> -> vector<128x128xf32>
    %101 = vector.broadcast %4 : vector<128x1xf32> to vector<128x128xf32>
    %102 = arith.mulf %100, %101 : vector<128x128xf32>
    %103 = arith.truncf %102 : vector<128x128xf32> to vector<128x128xbf16>
    %cst_46 = arith.constant dense<0.000000e+00> : vector<8x128xf32>
    %104 = tpu.matmul %99, %103, %cst_46 {dimension_numbers = #tpu.dot_dimension_numbers<[1], [0], [0], [1], [0, 0, 1, 1], [], []>} : vector<8x128xbf16>, vector<128x128xbf16>, vector<8x128xf32> -> vector<8x128xf32>
    %105 = arith.addf %70, %104 : vector<8x128xf32>
    %106 = vector.extract_strided_slice %30 {offsets = [0, 256], sizes = [8, 128], strides = [1, 1]} : vector<8x512xbf16> to vector<8x128xbf16>
    %107 = vector.extract_strided_slice %33 {offsets = [0, 2], sizes = [8, 1], strides = [1, 1]} : vector<8x4xf32> to vector<8x1xf32>
    %108 = vector.extract_strided_slice %34 {offsets = [2, 0], sizes = [1, 128], strides = [1, 1]} : vector<4x128xf32> to vector<1x128xf32>
    %109 = vector.broadcast %107 : vector<8x1xf32> to vector<8x128xf32>
    %110 = vector.broadcast %108 : vector<1x128xf32> to vector<8x128xf32>
    %111 = arith.addf %109, %110 : vector<8x128xf32>
    %cst_47 = arith.constant 0.000000e+00 : f32
    %112 = vector.broadcast %cst_47 : f32 to vector<8x128xf32>
    %113 = arith.cmpf oge, %111, %112 : vector<8x128xf32>
    %cst_48 = arith.constant 2.000000e-01 : f32
    %114 = vector.broadcast %cst_48 : f32 to vector<8x128xf32>
    %115 = arith.mulf %114, %111 : vector<8x128xf32>
    %116 = arith.select %113, %111, %115 : vector<8x128xi1>, vector<8x128xf32>
    %cst_49 = arith.constant -1.000000e+30 : f32
    %117 = vector.broadcast %cst_49 : f32 to vector<8x128xf32>
    %118 = arith.select %3, %116, %117 : vector<8x128xi1>, vector<8x128xf32>
    %cst_50 = arith.constant dense<0xFF800000> : vector<128xf32>
    %119 = vector.multi_reduction <maximumf>, %118, %cst_50 [0] : vector<8x128xf32> to vector<128xf32>
    %120 = vector.shape_cast %119 : vector<128xf32> to vector<1x128xf32>
    %121 = vector.broadcast %120 : vector<1x128xf32> to vector<8x128xf32>
    %122 = arith.subf %118, %121 : vector<8x128xf32>
    %123 = math.exp %122 : vector<8x128xf32>
    %cst_51 = arith.constant 0.000000e+00 : f32
    %124 = vector.broadcast %cst_51 : f32 to vector<8x128xf32>
    %125 = arith.select %3, %123, %124 : vector<8x128xi1>, vector<8x128xf32>
    %cst_52 = arith.constant dense<0.000000e+00> : vector<128xf32>
    %126 = vector.multi_reduction <add>, %125, %cst_52 [0] : vector<8x128xf32> to vector<128xf32>
    %127 = vector.shape_cast %126 : vector<128xf32> to vector<1x128xf32>
    %cst_53 = arith.constant 1.000000e-30 : f32
    %128 = vector.broadcast %cst_53 : f32 to vector<1x128xf32>
    %129 = arith.maximumf %127, %128 : vector<1x128xf32>
    %cst_54 = arith.constant 1.000000e+00 : f32
    %130 = vector.broadcast %cst_54 : f32 to vector<1x128xf32>
    %131 = arith.divf %130, %129 : vector<1x128xf32>
    %132 = vector.broadcast %131 : vector<1x128xf32> to vector<8x128xf32>
    %133 = arith.mulf %125, %132 : vector<8x128xf32>
    %134 = arith.truncf %133 : vector<8x128xf32> to vector<8x128xbf16>
    %cst_55 = arith.constant dense<0.000000e+00> : vector<128x128xf32>
    %135 = tpu.matmul %134, %106, %cst_55 {dimension_numbers = #tpu.dot_dimension_numbers<[0], [0], [1], [1], [0, 1, 1, 1], [], []>} : vector<8x128xbf16>, vector<8x128xbf16>, vector<128x128xf32> -> vector<128x128xf32>
    %136 = vector.broadcast %4 : vector<128x1xf32> to vector<128x128xf32>
    %137 = arith.mulf %135, %136 : vector<128x128xf32>
    %138 = arith.truncf %137 : vector<128x128xf32> to vector<128x128xbf16>
    %cst_56 = arith.constant dense<0.000000e+00> : vector<8x128xf32>
    %139 = tpu.matmul %134, %138, %cst_56 {dimension_numbers = #tpu.dot_dimension_numbers<[1], [0], [0], [1], [0, 0, 1, 1], [], []>} : vector<8x128xbf16>, vector<128x128xbf16>, vector<8x128xf32> -> vector<8x128xf32>
    %140 = arith.addf %105, %139 : vector<8x128xf32>
    %141 = vector.extract_strided_slice %30 {offsets = [0, 384], sizes = [8, 128], strides = [1, 1]} : vector<8x512xbf16> to vector<8x128xbf16>
    %142 = vector.extract_strided_slice %33 {offsets = [0, 3], sizes = [8, 1], strides = [1, 1]} : vector<8x4xf32> to vector<8x1xf32>
    %143 = vector.extract_strided_slice %34 {offsets = [3, 0], sizes = [1, 128], strides = [1, 1]} : vector<4x128xf32> to vector<1x128xf32>
    %144 = vector.broadcast %142 : vector<8x1xf32> to vector<8x128xf32>
    %145 = vector.broadcast %143 : vector<1x128xf32> to vector<8x128xf32>
    %146 = arith.addf %144, %145 : vector<8x128xf32>
    %cst_57 = arith.constant 0.000000e+00 : f32
    %147 = vector.broadcast %cst_57 : f32 to vector<8x128xf32>
    %148 = arith.cmpf oge, %146, %147 : vector<8x128xf32>
    %cst_58 = arith.constant 2.000000e-01 : f32
    %149 = vector.broadcast %cst_58 : f32 to vector<8x128xf32>
    %150 = arith.mulf %149, %146 : vector<8x128xf32>
    %151 = arith.select %148, %146, %150 : vector<8x128xi1>, vector<8x128xf32>
    %cst_59 = arith.constant -1.000000e+30 : f32
    %152 = vector.broadcast %cst_59 : f32 to vector<8x128xf32>
    %153 = arith.select %3, %151, %152 : vector<8x128xi1>, vector<8x128xf32>
    %cst_60 = arith.constant dense<0xFF800000> : vector<128xf32>
    %154 = vector.multi_reduction <maximumf>, %153, %cst_60 [0] : vector<8x128xf32> to vector<128xf32>
    %155 = vector.shape_cast %154 : vector<128xf32> to vector<1x128xf32>
    %156 = vector.broadcast %155 : vector<1x128xf32> to vector<8x128xf32>
    %157 = arith.subf %153, %156 : vector<8x128xf32>
    %158 = math.exp %157 : vector<8x128xf32>
    %cst_61 = arith.constant 0.000000e+00 : f32
    %159 = vector.broadcast %cst_61 : f32 to vector<8x128xf32>
    %160 = arith.select %3, %158, %159 : vector<8x128xi1>, vector<8x128xf32>
    %cst_62 = arith.constant dense<0.000000e+00> : vector<128xf32>
    %161 = vector.multi_reduction <add>, %160, %cst_62 [0] : vector<8x128xf32> to vector<128xf32>
    %162 = vector.shape_cast %161 : vector<128xf32> to vector<1x128xf32>
    %cst_63 = arith.constant 1.000000e-30 : f32
    %163 = vector.broadcast %cst_63 : f32 to vector<1x128xf32>
    %164 = arith.maximumf %162, %163 : vector<1x128xf32>
    %cst_64 = arith.constant 1.000000e+00 : f32
    %165 = vector.broadcast %cst_64 : f32 to vector<1x128xf32>
    %166 = arith.divf %165, %164 : vector<1x128xf32>
    %167 = vector.broadcast %166 : vector<1x128xf32> to vector<8x128xf32>
    %168 = arith.mulf %160, %167 : vector<8x128xf32>
    %169 = arith.truncf %168 : vector<8x128xf32> to vector<8x128xbf16>
    %cst_65 = arith.constant dense<0.000000e+00> : vector<128x128xf32>
    %170 = tpu.matmul %169, %141, %cst_65 {dimension_numbers = #tpu.dot_dimension_numbers<[0], [0], [1], [1], [0, 1, 1, 1], [], []>} : vector<8x128xbf16>, vector<8x128xbf16>, vector<128x128xf32> -> vector<128x128xf32>
    %171 = vector.broadcast %4 : vector<128x1xf32> to vector<128x128xf32>
    %172 = arith.mulf %170, %171 : vector<128x128xf32>
    %173 = arith.truncf %172 : vector<128x128xf32> to vector<128x128xbf16>
    %cst_66 = arith.constant dense<0.000000e+00> : vector<8x128xf32>
    %174 = tpu.matmul %169, %173, %cst_66 {dimension_numbers = #tpu.dot_dimension_numbers<[1], [0], [0], [1], [0, 0, 1, 1], [], []>} : vector<8x128xbf16>, vector<128x128xbf16>, vector<8x128xf32> -> vector<8x128xf32>
    %175 = arith.addf %140, %174 : vector<8x128xf32>
    %cst_67 = arith.constant 2.500000e-01 : f32
    %176 = vector.broadcast %cst_67 : f32 to vector<8x1xf32>
    %177 = arith.mulf %5, %176 : vector<8x1xf32>
    %178 = vector.broadcast %177 : vector<8x1xf32> to vector<8x128xf32>
    %179 = arith.mulf %175, %178 : vector<8x128xf32>
    %180 = vector.extract_strided_slice %6 {offsets = [3, 0], sizes = [1, 128], strides = [1, 1]} : vector<9x128xf32> to vector<1x128xf32>
    %181 = vector.broadcast %180 : vector<1x128xf32> to vector<8x128xf32>
    %182 = arith.addf %179, %181 : vector<8x128xf32>
    %183 = arith.addf %24, %182 : vector<8x128xf32>
    %184 = vector.extract_strided_slice %6 {offsets = [4, 0], sizes = [1, 128], strides = [1, 1]} : vector<9x128xf32> to vector<1x128xf32>
    %185 = vector.broadcast %184 : vector<1x128xf32> to vector<8x128xf32>
    %186 = arith.mulf %183, %185 : vector<8x128xf32>
    %187 = vector.extract_strided_slice %6 {offsets = [5, 0], sizes = [1, 128], strides = [1, 1]} : vector<9x128xf32> to vector<1x128xf32>
    %188 = vector.broadcast %187 : vector<1x128xf32> to vector<8x128xf32>
    %189 = arith.addf %186, %188 : vector<8x128xf32>
    %c0_68 = arith.constant 0 : index
    %c0_69 = arith.constant 0 : index
    %190 = vector.load %arg9[%c0_68, %c0_69] : memref<128x128xbf16, #tpu.memory_space<vmem>>, vector<128x128xbf16>
    %c0_70 = arith.constant 0 : index
    %c0_71 = arith.constant 0 : index
    %191 = vector.load %arg10[%c0_70, %c0_71] : memref<128x1xbf16, #tpu.memory_space<vmem>>, vector<128x1xbf16>
    %c0_72 = arith.constant 0 : index
    %c0_73 = arith.constant 0 : index
    %192 = vector.load %arg11[%c0_72, %c0_73] : memref<1x128xbf16, #tpu.memory_space<vmem>>, vector<1x128xbf16>
    %193 = arith.truncf %189 : vector<8x128xf32> to vector<8x128xbf16>
    %cst_74 = arith.constant dense<0.000000e+00> : vector<8x128xf32>
    %194 = tpu.matmul %193, %190, %cst_74 {dimension_numbers = #tpu.dot_dimension_numbers<[1], [0], [0], [1], [0, 0, 1, 1], [], []>} : vector<8x128xbf16>, vector<128x128xbf16>, vector<8x128xf32> -> vector<8x128xf32>
    %195 = arith.truncf %194 : vector<8x128xf32> to vector<8x128xbf16>
    %cst_75 = arith.constant dense<0.000000e+00> : vector<128x128xf32>
    %196 = tpu.matmul %1, %195, %cst_75 {dimension_numbers = #tpu.dot_dimension_numbers<[0], [0], [1], [1], [0, 1, 1, 1], [], []>} : vector<8x128xbf16>, vector<8x128xbf16>, vector<128x128xf32> -> vector<128x128xf32>
    %197 = arith.truncf %196 : vector<128x128xf32> to vector<128x128xbf16>
    %cst_76 = arith.constant dense<0.000000e+00> : vector<8x1xf32>
    %198 = tpu.matmul %195, %191, %cst_76 {dimension_numbers = #tpu.dot_dimension_numbers<[1], [0], [0], [1], [0, 0, 1, 1], [], []>} : vector<8x128xbf16>, vector<128x1xbf16>, vector<8x1xf32> -> vector<8x1xf32>
    %cst_77 = arith.constant dense<0.000000e+00> : vector<1x128xf32>
    %199 = tpu.matmul %192, %197, %cst_77 {dimension_numbers = #tpu.dot_dimension_numbers<[1], [1], [0], [0], [0, 0, 1, 0], [], []>} : vector<1x128xbf16>, vector<128x128xbf16>, vector<1x128xf32> -> vector<1x128xf32>
    %cst_78 = arith.constant 0.000000e+00 : f32
    %200 = vector.broadcast %cst_78 : f32 to vector<8x128xf32>
    %201 = vector.broadcast %198 : vector<8x1xf32> to vector<8x128xf32>
    %202 = vector.broadcast %199 : vector<1x128xf32> to vector<8x128xf32>
    %203 = arith.addf %201, %202 : vector<8x128xf32>
    %cst_79 = arith.constant 0.000000e+00 : f32
    %204 = vector.broadcast %cst_79 : f32 to vector<8x128xf32>
    %205 = arith.cmpf oge, %203, %204 : vector<8x128xf32>
    %cst_80 = arith.constant 2.000000e-01 : f32
    %206 = vector.broadcast %cst_80 : f32 to vector<8x128xf32>
    %207 = arith.mulf %206, %203 : vector<8x128xf32>
    %208 = arith.select %205, %203, %207 : vector<8x128xi1>, vector<8x128xf32>
    %cst_81 = arith.constant -1.000000e+30 : f32
    %209 = vector.broadcast %cst_81 : f32 to vector<8x128xf32>
    %210 = arith.select %3, %208, %209 : vector<8x128xi1>, vector<8x128xf32>
    %cst_82 = arith.constant dense<0xFF800000> : vector<128xf32>
    %211 = vector.multi_reduction <maximumf>, %210, %cst_82 [0] : vector<8x128xf32> to vector<128xf32>
    %212 = vector.shape_cast %211 : vector<128xf32> to vector<1x128xf32>
    %213 = vector.broadcast %212 : vector<1x128xf32> to vector<8x128xf32>
    %214 = arith.subf %210, %213 : vector<8x128xf32>
    %215 = math.exp %214 : vector<8x128xf32>
    %cst_83 = arith.constant 0.000000e+00 : f32
    %216 = vector.broadcast %cst_83 : f32 to vector<8x128xf32>
    %217 = arith.select %3, %215, %216 : vector<8x128xi1>, vector<8x128xf32>
    %cst_84 = arith.constant dense<0.000000e+00> : vector<128xf32>
    %218 = vector.multi_reduction <add>, %217, %cst_84 [0] : vector<8x128xf32> to vector<128xf32>
    %219 = vector.shape_cast %218 : vector<128xf32> to vector<1x128xf32>
    %cst_85 = arith.constant 1.000000e-30 : f32
    %220 = vector.broadcast %cst_85 : f32 to vector<1x128xf32>
    %221 = arith.maximumf %219, %220 : vector<1x128xf32>
    %cst_86 = arith.constant 1.000000e+00 : f32
    %222 = vector.broadcast %cst_86 : f32 to vector<1x128xf32>
    %223 = arith.divf %222, %221 : vector<1x128xf32>
    %224 = vector.broadcast %223 : vector<1x128xf32> to vector<8x128xf32>
    %225 = arith.mulf %217, %224 : vector<8x128xf32>
    %226 = arith.truncf %225 : vector<8x128xf32> to vector<8x128xbf16>
    %cst_87 = arith.constant dense<0.000000e+00> : vector<128x128xf32>
    %227 = tpu.matmul %226, %195, %cst_87 {dimension_numbers = #tpu.dot_dimension_numbers<[0], [0], [1], [1], [0, 1, 1, 1], [], []>} : vector<8x128xbf16>, vector<8x128xbf16>, vector<128x128xf32> -> vector<128x128xf32>
    %228 = vector.broadcast %4 : vector<128x1xf32> to vector<128x128xf32>
    %229 = arith.mulf %227, %228 : vector<128x128xf32>
    %230 = arith.truncf %229 : vector<128x128xf32> to vector<128x128xbf16>
    %cst_88 = arith.constant dense<0.000000e+00> : vector<8x128xf32>
    %231 = tpu.matmul %226, %230, %cst_88 {dimension_numbers = #tpu.dot_dimension_numbers<[1], [0], [0], [1], [0, 0, 1, 1], [], []>} : vector<8x128xbf16>, vector<128x128xbf16>, vector<8x128xf32> -> vector<8x128xf32>
    %232 = arith.addf %200, %231 : vector<8x128xf32>
    %cst_89 = arith.constant 1.000000e+00 : f32
    %233 = vector.broadcast %cst_89 : f32 to vector<8x1xf32>
    %234 = arith.mulf %5, %233 : vector<8x1xf32>
    %235 = vector.broadcast %234 : vector<8x1xf32> to vector<8x128xf32>
    %236 = arith.mulf %232, %235 : vector<8x128xf32>
    %237 = vector.extract_strided_slice %6 {offsets = [6, 0], sizes = [1, 128], strides = [1, 1]} : vector<9x128xf32> to vector<1x128xf32>
    %238 = vector.broadcast %237 : vector<1x128xf32> to vector<8x128xf32>
    %239 = arith.addf %236, %238 : vector<8x128xf32>
    %240 = arith.addf %189, %239 : vector<8x128xf32>
    %241 = vector.extract_strided_slice %6 {offsets = [7, 0], sizes = [1, 128], strides = [1, 1]} : vector<9x128xf32> to vector<1x128xf32>
    %242 = vector.broadcast %241 : vector<1x128xf32> to vector<8x128xf32>
    %243 = arith.mulf %240, %242 : vector<8x128xf32>
    %244 = vector.extract_strided_slice %6 {offsets = [8, 0], sizes = [1, 128], strides = [1, 1]} : vector<9x128xf32> to vector<1x128xf32>
    %245 = vector.broadcast %244 : vector<1x128xf32> to vector<8x128xf32>
    %246 = arith.addf %243, %245 : vector<8x128xf32>
    %247 = arith.truncf %246 : vector<8x128xf32> to vector<8x128xbf16>
    %c0_90 = arith.constant 0 : index
    %c0_91 = arith.constant 0 : index
    %248 = vector.load %arg5[%c0_90, %c0_91] : memref<128x256xbf16, #tpu.memory_space<vmem>>, vector<128x256xbf16>
    %cst_92 = arith.constant dense<0.000000e+00> : vector<8x256xf32>
    %249 = tpu.matmul %247, %248, %cst_92 {dimension_numbers = #tpu.dot_dimension_numbers<[1], [0], [0], [1], [0, 0, 1, 1], [], []>} : vector<8x128xbf16>, vector<128x256xbf16>, vector<8x256xf32> -> vector<8x256xf32>
    %250 = vector.extract_strided_slice %7 {offsets = [0, 0], sizes = [1, 256], strides = [1, 1]} : vector<3x256xf32> to vector<1x256xf32>
    %251 = vector.broadcast %250 : vector<1x256xf32> to vector<8x256xf32>
    %252 = arith.addf %249, %251 : vector<8x256xf32>
    %cst_93 = arith.constant 0.000000e+00 : f32
    %253 = vector.broadcast %cst_93 : f32 to vector<8x256xf32>
    %254 = arith.cmpf oge, %252, %253 : vector<8x256xf32>
    %cst_94 = arith.constant 2.000000e-01 : f32
    %255 = vector.broadcast %cst_94 : f32 to vector<8x256xf32>
    %256 = arith.mulf %255, %252 : vector<8x256xf32>
    %257 = arith.select %254, %252, %256 : vector<8x256xi1>, vector<8x256xf32>
    %258 = arith.addf %0, %257 : vector<8x256xf32>
    %259 = vector.extract_strided_slice %7 {offsets = [1, 0], sizes = [1, 256], strides = [1, 1]} : vector<3x256xf32> to vector<1x256xf32>
    %260 = vector.broadcast %259 : vector<1x256xf32> to vector<8x256xf32>
    %261 = arith.mulf %258, %260 : vector<8x256xf32>
    %262 = vector.extract_strided_slice %7 {offsets = [2, 0], sizes = [1, 256], strides = [1, 1]} : vector<3x256xf32> to vector<1x256xf32>
    %263 = vector.broadcast %262 : vector<1x256xf32> to vector<8x256xf32>
    %264 = arith.addf %261, %263 : vector<8x256xf32>
    %c0_95 = arith.constant 0 : index
    %c0_96 = arith.constant 0 : index
    %265 = vector.load %arg14[%c0_95, %c0_96] : memref<8x256xf32, #tpu.memory_space<vmem>>, vector<8x256xf32>
    tpu.vector_store %arg14[%c0_95, %c0_96], %264 {strides = array<i32>} : memref<8x256xf32, #tpu.memory_space<vmem>>, vector<8x256xf32>,
    return
  }
}

</mosaic_0001>

<bundles_post_ra>
// kernel: hgat_forward.1
= control target key start
LH: loop header
LB: loop body
LE: loop exit
PB: predicated region body
PF: predicated region fallthrough
CT: control target
= control target key end

     0   :  { %19 = vsyncpa [#allocation3], 0  ;;  %s3245_s16 = smov [#allocation2]   ;;  %s3246_s18 = smov 128   ;;  %s4388_s0 = inlined_call_operand.vmem [shape: f32[8,256], index: 0, kind: input, shape index: {}]   ;;  %s4389_s1 = inlined_call_operand.vmem [shape: bf16[8,128], index: 1, kind: input, shape index: {}]   ;;  %s4390_s2 = inlined_call_operand.vmem [shape: f32[128,1], index: 2, kind: input, shape index: {}]   ;;  %s4391_s3 = inlined_call_operand.vmem [shape: f32[8,1], index: 3, kind: input, shape index: {}]   ;;  %s4392_s4 = inlined_call_operand.vmem [shape: bf16[256,128], index: 4, kind: input, shape index: {}]   ;;  %s4393_s5 = inlined_call_operand.hbm [shape: bf16[128,256], index: 5, kind: input, shape index: {}]   ;;  %s4394_s6 = inlined_call_operand.vmem [shape: bf16[128,512], index: 6, kind: input, shape index: {}]   ;;  %s4395_s7 = inlined_call_operand.vmem [shape: bf16[512,4], index: 7, kind: input, shape index: {}]   ;;  %s4396_s8 = inlined_call_operand.vmem [shape: bf16[4,512], index: 8, kind: input, shape index: {}]   ;;  %s4397_s9 = inlined_call_operand.vmem [shape: bf16[128,128], index: 9, kind: input, shape index: {}]   ;;  %s4398_s10 = inlined_call_operand.vmem [shape: bf16[128,1], index: 10, kind: input, shape index: {}]   ;;  %s4399_s11 = inlined_call_operand.vmem [shape: bf16[1,128], index: 11, kind: input, shape index: {}]   ;;  %s4400_s12 = inlined_call_operand.vmem [shape: f32[9,128], index: 12, kind: input, shape index: {}]   ;;  %s4401_s13 = inlined_call_operand.vmem [shape: f32[3,256], index: 13, kind: input, shape index: {}]   ;;  %s4402_s14 = inlined_call_operand.vmem [shape: f32[8,256], index: 14, kind: output, shape index: {}]  }
   0x1   :  { %s34_s15 = sshll.u32 %s4393_s5, 4  ;;  %s36_s17 = sshll.u32 %s3245_s16, 4  ;;  %s35_s15 = int_to_ptr.hbm [resolvable:$true] %s34_s15  ;;  %s37_s17 = int_to_ptr.vmem [resolvable:$true] %s36_s17 }
   0x2   :  { %s3247_s19 = smov 8  }
   0x3   :  { %42 = dma.hbm_to_vmem [thread:$0]  %s35_s15, 2048, %s37_s17, [#allocation3], %s3246_s18, %s3246_s18, %s3247_s19  }
   0x4   :  { %3243 = dma.done.wait [#allocation3], 2048  }
   0x5   :  { %3244 = vsyncadd [#allocation3], 4294965248  ;;  %v3060_v0 = vld [vmem:[%s4392_s4 + $0x38] sm:$0xff]  ;;  %v3059_v2 = vld [vmem:[%s4392_s4 + $0x30] sm:$0xff]  ;;  %vm616_vm1 = vcmask 1043456   ;;  %vm591_vm2 = vcmask 64512  }
   0x6   :  { %v3068_v1 = vld [vmem:[%s4392_s4 + $0x78] sm:$0xff]  ;;  %220 = vmatpush.bf16.msra.mxu0 %v3060_v0  ;;  %v3067_v3 = vld [vmem:[%s4392_s4 + $0x70] sm:$0xff]  ;;  %v3058_v4 = vld [vmem:[%s4392_s4 + $0x28] sm:$0xff] }
   0x7   :  { %233 = vmatpush.bf16.msra.mxu1 %v3068_v1  ;;  %v3066_v5 = vld [vmem:[%s4392_s4 + $0x68] sm:$0xff]  ;;  %v3057_v6 = vld [vmem:[%s4392_s4 + $0x20] sm:$0xff]  ;;  %v3099_v9 = vld [vmem:[%s4394_s6 + $0xec] sm:$0xf0] }
   0x8   :  { %v3065_v7 = vld [vmem:[%s4392_s4 + $0x60] sm:$0xff]  ;;  %v3056_v12 = vld [vmem:[%s4392_s4 + $0x18] sm:$0xff]  ;;  %v3095_v15 = vld [vmem:[%s4394_s6 + $0xcc] sm:$0xf0] }
   0x9   :  { %v2703_v8 = vld [vmem:[%s4394_s6 + $0xe0] sm:$0xf]  ;;  %v3064_v13 = vld [vmem:[%s4392_s4 + $0x58] sm:$0xff]  ;;  %v3055_v17 = vld [vmem:[%s4392_s4 + $0x10] sm:$0xff] }
   0xa   :  { %221 = vmatpush.bf16.msra.mxu0 %v3059_v2  ;;  %v2704_v10 = vor.u32 %v3099_v9, %v2703_v8  ;;  %v3363_v11 = vld [vmem:[%s4389_s1] sm:$0xf]  ;;  %v3063_v18 = vld [vmem:[%s4392_s4 + $0x50] sm:$0xff]  ;;  %v3054_v22 = vld [vmem:[%s4392_s4 + $0x8] sm:$0xff] }
   0xb   :  { %234 = vmatpush.bf16.msra.mxu1 %v3067_v3  ;;  %4417 = vst [vmem:[#allocation5_spill] sm:$0xff] %v3363_v11  ;;  %565 = vxpose.xlu0.c.b16.start.end [1/1] (short) %v3363_v11, 128  ;;  %v2687_v14 = vld [vmem:[%s4394_s6 + $0xc0] sm:$0xf]  ;;  %v3091_v20 = vld [vmem:[%s4394_s6 + $0xac] sm:$0xf0]  ;;  %v3062_v23 = vld [vmem:[%s4392_s4 + $0x48] sm:$0xff] }
   0xc   :  { %511 = vmatpush.bf16.msra.mxu2 %v2704_v10  ;;  %v2688_v16 = vor.u32 %v3095_v15, %v2687_v14  ;;  %v2671_v19 = vld [vmem:[%s4394_s6 + $0xa0] sm:$0xf]  ;;  %v3097_v24 = vld [vmem:[%s4394_s6 + $0xe4] sm:$0xf]  ;;  %v3087_v26 = vld [vmem:[%s4394_s6 + $0x8c] sm:$0xf0] }
   0xd   :  { %v2672_v21 = vor.u32 %v3091_v20, %v2671_v19  ;;  %v2655_v25 = vld [vmem:[%s4394_s6 + $0x80] sm:$0xf]  ;;  %v2705_v27 = vld [vmem:[%s4394_s6 + $0xf0] sm:$0xf0]  ;;  %v2711_v28 = vld [vmem:[%s4394_s6 + $0xe8] sm:$0xf] }
   0xe   :  { %222 = vmatpush.bf16.msra.mxu0 %v3058_v4  ;;  %v3100_v29 = vld [vmem:[%s4394_s6 + $0xf4] sm:$0xf0]  ;;  %v2656_v30 = vor.u32 %v3087_v26, %v2655_v25  ;;  %v3053_v31 = vld [vmem:[%s4392_s4] sm:$0xff]  ;;  %v65_v34 = vld [vmem:[%s4388_s0 + $0x8] sm:$0xff]  ;;  %v2708_v35 = vor.u32 %v3097_v24, %v2705_v27 }
   0xf   :  { %235 = vmatpush.bf16.msra.mxu1 %v3066_v5  ;;  %v3061_v32 = vld [vmem:[%s4392_s4 + $0x40] sm:$0xff]  ;;  %v2712_v37 = vor.u32 %v3100_v29, %v2711_v28  ;;  %v3083_v39 = vld [vmem:[%s4394_s6 + $0x6c] sm:$0xf0]  ;;  %v2689_v40 = vld [vmem:[%s4394_s6 + $0xd0] sm:$0xf0]  ;;  %v90_v45 = vpack.c.bf16 %v65_v34, %v65_v34 }
  0x10   :  { %512 = vmatpush.bf16.msra.mxu2 %v2688_v16  ;;  %v64_v33 = vld [vmem:[%s4388_s0] sm:$0xff]  ;;  %v2695_v41 = vld [vmem:[%s4394_s6 + $0xc8] sm:$0xf]  ;;  %v3096_v42 = vld [vmem:[%s4394_s6 + $0xd4] sm:$0xf0] }
  0x11   :  { %v3093_v36 = vld [vmem:[%s4394_s6 + $0xc4] sm:$0xf]  ;;  %v2639_v38 = vld [vmem:[%s4394_s6 + $0x60] sm:$0xf]  ;;  %v89_v44 = vpack.c.bf16 %v64_v33, %v64_v33  ;;  %v2696_v48 = vor.u32 %v3096_v42, %v2695_v41  ;;  %v2673_v49 = vld [vmem:[%s4394_s6 + $0xb0] sm:$0xf0] }
  0x12   :  { %223 = vmatpush.bf16.msra.mxu0 %v3057_v6  ;;  %v2640_v43 = vor.u32 %v3083_v39, %v2639_v38  ;;  %v2692_v46 = vor.u32 %v3093_v36, %v2689_v40  ;;  %v3089_v47 = vld [vmem:[%s4394_s6 + $0xa4] sm:$0xf]  ;;  %v2679_v50 = vld [vmem:[%s4394_s6 + $0xa8] sm:$0xf]  ;;  %v3092_v51 = vld [vmem:[%s4394_s6 + $0xb4] sm:$0xf0] }
  0x13   :  { %236 = vmatpush.bf16.msra.mxu1 %v3065_v7  ;;  %v2676_v52 = vor.u32 %v3089_v47, %v2673_v49  ;;  %v3085_v53 = vld [vmem:[%s4394_s6 + $0x84] sm:$0xf]  ;;  %v2680_v54 = vor.u32 %v3092_v51, %v2679_v50  ;;  %v2657_v55 = vld [vmem:[%s4394_s6 + $0x90] sm:$0xf0]  ;;  %v2663_v56 = vld [vmem:[%s4394_s6 + $0x88] sm:$0xf] }
  0x14   :  { %513 = vmatpush.bf16.msra.mxu2 %v2672_v21  ;;  %v3088_v57 = vld [vmem:[%s4394_s6 + $0x94] sm:$0xf0]  ;;  %v2660_v58 = vor.u32 %v3085_v53, %v2657_v55  ;;  %v3081_v59 = vld [vmem:[%s4394_s6 + $0x64] sm:$0xf]  ;;  %v2641_v61 = vld [vmem:[%s4394_s6 + $0x70] sm:$0xf0] }
  0x15   :  { %v2664_v60 = vor.u32 %v3088_v57, %v2663_v56  ;;  %v2647_v62 = vld [vmem:[%s4394_s6 + $0x68] sm:$0xf]  ;;  %v3084_v63 = vld [vmem:[%s4394_s6 + $0x74] sm:$0xf0]  ;;  %v2644_v0 = vor.u32 %v3081_v59, %v2641_v61  ;;  %v3077_v2 = vld [vmem:[%s4394_s6 + $0x44] sm:$0xf] }
  0x16   :  { %224 = vmatpush.bf16.msra.mxu0 %v3056_v12  ;;  %v2648_v1 = vor.u32 %v3084_v63, %v2647_v62  ;;  %v2625_v3 = vld [vmem:[%s4394_s6 + $0x50] sm:$0xf0]  ;;  %v3073_v5 = vld [vmem:[%s4394_s6 + $0x24] sm:$0xf]  ;;  %v3098_v10 = vld [vmem:[%s4394_s6 + $0xec] sm:$0xf] }
  0x17   :  { %237 = vmatpush.bf16.msra.mxu1 %v3064_v13  ;;  %v2628_v4 = vor.u32 %v3077_v2, %v2625_v3  ;;  %v2609_v6 = vld [vmem:[%s4394_s6 + $0x30] sm:$0xf0]  ;;  %v3069_v8 = vld [vmem:[%s4394_s6 + $0x4] sm:$0xf]  ;;  %v2713_v12 = vld [vmem:[%s4394_s6 + $0xf8] sm:$0xf0] }
  0x18   :  { %514 = vmatpush.bf16.msra.mxu2 %v2656_v30  ;;  %v2612_v7 = vor.u32 %v3073_v5, %v2609_v6  ;;  %v2593_v9 = vld [vmem:[%s4394_s6 + $0x10] sm:$0xf0]  ;;  %v2716_v14 = vor.u32 %v3098_v10, %v2713_v12  ;;  %v2623_v15 = vld [vmem:[%s4394_s6 + $0x40] sm:$0xf]  ;;  %v3079_v16 = vld [vmem:[%s4394_s6 + $0x4c] sm:$0xf0] }
  0x19   :  { %v2596_v13 = vor.u32 %v3069_v8, %v2593_v9  ;;  %v3080_v19 = vld [vmem:[%s4394_s6 + $0x54] sm:$0xf0]  ;;  %v3094_v20 = vld [vmem:[%s4394_s6 + $0xcc] sm:$0xf]  ;;  %v2697_v21 = vld [vmem:[%s4394_s6 + $0xd8] sm:$0xf0] }
  0x1a   :  { %225 = vmatpush.bf16.msra.mxu0 %v3055_v17  ;;  %v2631_v17 = vld [vmem:[%s4394_s6 + $0x48] sm:$0xf]  ;;  %v2607_v24 = vld [vmem:[%s4394_s6 + $0x20] sm:$0xf]  ;;  %v3075_v25 = vld [vmem:[%s4394_s6 + $0x2c] sm:$0xf0] }
  0x1b   :  { %238 = vmatpush.bf16.msra.mxu1 %v3063_v18  ;;  %v2624_v18 = vor.u32 %v3079_v16, %v2623_v15  ;;  %v2615_v26 = vld [vmem:[%s4394_s6 + $0x28] sm:$0xf]  ;;  %v2608_v27 = vor.u32 %v3075_v25, %v2607_v24  ;;  %v3076_v28 = vld [vmem:[%s4394_s6 + $0x34] sm:$0xf0]  ;;  %v3090_v29 = vld [vmem:[%s4394_s6 + $0xac] sm:$0xf] }
  0x1c   :  { %515 = vmatpush.bf16.msra.mxu2 %v2640_v43  ;;  %v2681_v30 = vld [vmem:[%s4394_s6 + $0xb8] sm:$0xf0]  ;;  %v2591_v33 = vld [vmem:[%s4394_s6] sm:$0xf]  ;;  %v3071_v34 = vld [vmem:[%s4394_s6 + $0xc] sm:$0xf0] }
  0x1d   :  { %v2599_v36 = vld [vmem:[%s4394_s6 + $0x8] sm:$0xf]  ;;  %v3086_v38 = vld [vmem:[%s4394_s6 + $0x8c] sm:$0xf]  ;;  %v2665_v40 = vld [vmem:[%s4394_s6 + $0x98] sm:$0xf0] }
  0x1e   :  { %226 = vmatpush.bf16.msra.mxu0 %v3054_v22  ;;  %v2632_v22 = vor.u32 %v3080_v19, %v2631_v17  ;;  %v2668_v41 = vor.u32 %v3086_v38, %v2665_v40  ;;  %v3082_v42 = vld [vmem:[%s4394_s6 + $0x6c] sm:$0xf]  ;;  %v2649_v43 = vld [vmem:[%s4394_s6 + $0x78] sm:$0xf0] }
  0x1f   :  { %239 = vmatpush.bf16.msra.mxu1 %v3062_v23  ;;  %v2700_v23 = vor.u32 %v3094_v20, %v2697_v21  ;;  %v2617_v49 = vld [vmem:[%s4394_s6 + $0x38] sm:$0xf0]  ;;  %v3070_v51 = vld [vmem:[%s4394_s6 + $0xc] sm:$0xf] }
  0x20   :  { %516 = vmatpush.bf16.msra.mxu2 %v2624_v18  ;;  %v3114_v38 = vld [vmem:[%s4395_s7 + $0x68] sm:$0xff]  ;;  %v3132_v40 = vld [vmem:[%s4395_s7 + $0xf8] sm:$0xff] }
  0x22   :  { %227 = vmatpush.bf16.msra.mxu0 %v3053_v31  ;;  %v2616_v31 = vor.u32 %v3076_v28, %v2615_v26 }
  0x23   :  { %240 = vmatpush.bf16.msra.mxu1 %v3061_v32  ;;  %v2684_v32 = vor.u32 %v3090_v29, %v2681_v30 }
  0x24   :  { %517 = vmatpush.bf16.msra.mxu2 %v2608_v27 }
  0x25   :  { %228 = vmatmul.bf16.vlgmr.msra.gmra.mxu0 %v89_v44  ;;  %v2652_v44 = vor.u32 %v3082_v42, %v2649_v43  ;;  %v3113_v42 = vld [vmem:[%s4395_s7 + $0x60] sm:$0xff] }
  0x26   :  { %537 = vmatpush.bf16.msrb.mxu0 %v2712_v37  ;;  %241 = vmatmul.bf16.vlgmr.msra.gmra.mxu1 %v90_v45  ;;  %v3072_v37 = vld [vmem:[%s4394_s6 + $0x14] sm:$0xf0]  ;;  %v3078_v45 = vld [vmem:[%s4394_s6 + $0x4c] sm:$0xf] }
  0x27   :  { %524 = vmatpush.bf16.msrb.mxu1 %v2708_v35  ;;  %v2592_v35 = vor.u32 %v3071_v34, %v2591_v33  ;;  %v2600_v39 = vor.u32 %v3072_v37, %v2599_v36  ;;  %v3108_v33 = vld [vmem:[%s4395_s7 + $0x38] sm:$0xff]  ;;  %v3115_v36 = vld [vmem:[%s4395_s7 + $0x70] sm:$0xff]  ;;  %v3106_v37 = vld [vmem:[%s4395_s7 + $0x28] sm:$0xff] }
  0x28   :  { %v3116_v34 = vld [vmem:[%s4395_s7 + $0x78] sm:$0xff] }
  0x29   :  { %518 = vmatpush.bf16.msra.mxu2 %v2592_v35  ;;  %v3107_v35 = vld [vmem:[%s4395_s7 + $0x30] sm:$0xff] }
  0x2a   :  { %538 = vmatpush.bf16.msrb.mxu0 %v2696_v48  ;;  %v3074_v48 = vld [vmem:[%s4394_s6 + $0x2c] sm:$0xf] }
  0x2b   :  { %525 = vmatpush.bf16.msrb.mxu1 %v2692_v46  ;;  %v2633_v46 = vld [vmem:[%s4394_s6 + $0x58] sm:$0xf0]  ;;  %v2620_v50 = vor.u32 %v3074_v48, %v2617_v49  ;;  %v3122_v48 = vld [vmem:[%s4395_s7 + $0xa8] sm:$0xff] }
  0x2c   :  { %v2636_v47 = vor.u32 %v3078_v45, %v2633_v46  ;;  %v3131_v45 = vld [vmem:[%s4395_s7 + $0xf0] sm:$0xff]  ;;  %v3104_v46 = vld [vmem:[%s4395_s7 + $0x18] sm:$0xff]  ;;  %v3130_v49 = vld [vmem:[%s4395_s7 + $0xe8] sm:$0xff] }
  0x2e   :  { %539 = vmatpush.bf16.msrb.mxu0 %v2680_v54  ;;  %v86_v54 = vld [vmem:[%s4400_s12] sm:$0xff] }
  0x2f   :  { %526 = vmatpush.bf16.msrb.mxu1 %v2676_v52  ;;  %v2601_v52 = vld [vmem:[%s4394_s6 + $0x18] sm:$0xf0]  ;;  %v123_v55 = vperm.slane %v86_v54, 0  ;;  %v251_v62 = vperm.slane %v86_v54, 2 }
  0x30   :  { %v2604_v53 = vor.u32 %v3070_v51, %v2601_v52  ;;  %v3111_v51 = vld [vmem:[%s4395_s7 + $0x50] sm:$0xff]  ;;  %v3121_v52 = vld [vmem:[%s4395_s7 + $0xa0] sm:$0xff] }
  0x32   :  { %540 = vmatpush.bf16.msrb.mxu0 %v2664_v60  ;;  %v249_v60 = vperm.slane %v86_v54, 1  ;;  %v3102_v54 = vld [vmem:[%s4395_s7 + $0x8] sm:$0xff] }
  0x33   :  { %527 = vmatpush.bf16.msrb.mxu1 %v2660_v58 }
  0x36   :  { %541 = vmatpush.bf16.msrb.mxu0 %v2648_v1 }
  0x37   :  { %528 = vmatpush.bf16.msrb.mxu1 %v2644_v0 }
  0x3a   :  { %542 = vmatpush.bf16.msrb.mxu0 %v2632_v22 }
  0x3b   :  { %529 = vmatpush.bf16.msrb.mxu1 %v2628_v4 }
  0x3e   :  { %543 = vmatpush.bf16.msrb.mxu0 %v2616_v31 }
  0x3f   :  { %530 = vmatpush.bf16.msrb.mxu1 %v2612_v7 }
  0x42   :  { %544 = vmatpush.bf16.msrb.mxu0 %v2600_v39  ;;  %v3124_v39 = vld [vmem:[%s4395_s7 + $0xb8] sm:$0xff] }
  0x43   :  { %531 = vmatpush.bf16.msrb.mxu1 %v2596_v13 }
  0x47   :  { %550 = vmatpush.bf16.msra.mxu1 %v2716_v14 }
  0x4b   :  { %551 = vmatpush.bf16.msra.mxu1 %v2700_v23 }
  0x4f   :  { %552 = vmatpush.bf16.msra.mxu1 %v2684_v32 }
  0x53   :  { %553 = vmatpush.bf16.msra.mxu1 %v2668_v41  ;;  %v3105_v41 = vld [vmem:[%s4395_s7 + $0x20] sm:$0xff] }
  0x57   :  { %554 = vmatpush.bf16.msra.mxu1 %v2652_v44  ;;  %v3123_v44 = vld [vmem:[%s4395_s7 + $0xb0] sm:$0xff] }
  0x5b   :  { %555 = vmatpush.bf16.msra.mxu1 %v2636_v47  ;;  %v3112_v47 = vld [vmem:[%s4395_s7 + $0x58] sm:$0xff] }
  0x5f   :  { %556 = vmatpush.bf16.msra.mxu1 %v2620_v50  ;;  %v3103_v50 = vld [vmem:[%s4395_s7 + $0x10] sm:$0xff] }
  0x63   :  { %557 = vmatpush.bf16.msra.mxu1 %v2604_v53  ;;  %v3129_v53 = vld [vmem:[%s4395_s7 + $0xe0] sm:$0xff] }
  0xa2   :  { %v229_v56 = vpop.f32.mrf.mxu0 }
  0xa3   :  { %v242_v57 = vpop.f32.mrf.mxu1  ;;  %v230_v58 = vadd.f32 %v229_v56, %v123_v55  ;;  %v3110_v55 = vld [vmem:[%s4395_s7 + $0x48] sm:$0xff]  ;;  %v3120_v56 = vld [vmem:[%s4395_s7 + $0x98] sm:$0xff] }
  0xa5   :  { %v243_v59 = vadd.f32 %v242_v57, %v230_v58  ;;  %v3128_v57 = vld [vmem:[%s4395_s7 + $0xd8] sm:$0xff]  ;;  %v3101_v58 = vld [vmem:[%s4395_s7] sm:$0xff] }
  0xa7   :  { %vm246_vm0 = vcmp.ge.f32.partialorder %v243_v59, 0.0  ;;  %v247_v61 = vmul.f32 0.2, %v243_v59 }
  0xa9   :  { %v248_v63 = vsel %vm246_vm0, %v243_v59, %v247_v61  ;;  %v3109_v59 = vld [vmem:[%s4395_s7 + $0x40] sm:$0xff]  ;;  %v3119_v61 = vld [vmem:[%s4395_s7 + $0x90] sm:$0xff] }
  0xaa   :  { %v250_v0 = vmul.f32 %v249_v60, %v248_v63  ;;  %v231_v1 = vpop.f32.mrf.mxu0  ;;  %v3118_v63 = vld [vmem:[%s4395_s7 + $0x88] sm:$0xff] }
  0xab   :  { %v244_v2 = vpop.f32.mrf.mxu1  ;;  %v3117_v1 = vld [vmem:[%s4395_s7 + $0x80] sm:$0xff] }
  0xac   :  { %v3585_v3 = vadd.f32 %v251_v62, %v250_v0  ;;  %v3127_v62 = vld [vmem:[%s4395_s7 + $0xd0] sm:$0xff]  ;;  %v3126_v0 = vld [vmem:[%s4395_s7 + $0xc8] sm:$0xff]  ;;  %v3125_v2 = vld [vmem:[%s4395_s7 + $0xc0] sm:$0xff] }
  0xae   :  { %4418 = vst [vmem:[#allocation6_spill] sm:$0xff] %v3585_v3  ;;  %v350_v4 = vpack.c.bf16 %v3585_v3, %v3585_v3 }
  0xb0   :  { %519 = vmatmul.bf16.vlgmr.msra.gmra.mxu2 %v350_v4  ;;  %532 = vmatmul.bf16.vlgmr.msrb.gmra.mxu1 %v350_v4 }
  0xb1   :  { %545 = vmatmul.bf16.vlgmr.msrb.gmra.mxu0 %v350_v4 }
  0xb7   :  { %v3604_v19 = vpop.trf.xlu0 }
  0xb8   :  { %4421 = vst [vmem:[#allocation9_spill] sm:$0xff] %v3604_v19 }
  0xc0   :  { %558 = vmatmul.bf16.vlgmr.msra.gmra.mxu1 %v350_v4 }
  0xc7   :  { %v3629_v29 = vpop.trf.xlu0 }
  0xc8   :  { %4424 = vst [vmem:[#allocation12_spill] sm:$0xff] %v3629_v29 }
  0xd7   :  { %v3639_v30 = vpop.trf.xlu0 }
  0xd8   :  { %4425 = vst [vmem:[#allocation13_spill] sm:$0xff] %v3639_v30 }
  0xe7   :  { %v3649_v31 = vpop.trf.xlu0 }
  0xe8   :  { %4426 = vst [vmem:[#allocation14_spill] sm:$0xff] %v3649_v31 }
  0xf7   :  { %v3659_v32 = vpop.trf.xlu0 }
  0xf8   :  { %4427 = vst [vmem:[#allocation15_spill] sm:$0xff] %v3659_v32 }
 0x107   :  { %v3699_v43 = vpop.trf.xlu0 }
 0x108   :  { %4428 = vst [vmem:[#allocation16_spill] sm:$0xff] %v3699_v43 }
 0x117   :  { %v3757_v60 = vpop.trf.xlu0 }
 0x118   :  { %4429 = vst [vmem:[#allocation17_spill] sm:$0xff] %v3757_v60 }
 0x127   :  { %v3785_v4 = vpop.trf.xlu0 }
 0x128   :  { %4430 = vst [vmem:[#allocation18_spill] sm:$0xff] %v3785_v4 }
 0x12d   :  { %v533_v5 = vpop.f32.mrf.mxu1 }
 0x12e   :  { %v546_v6 = vpop.f32.mrf.mxu0 }
 0x133   :  { %v520_v7 = vpop.f32.mrf.mxu2 }
 0x134   :  { %v3589_v8 = vpack.c.bf16 %v533_v5, %v520_v7 }
 0x135   :  { %v535_v9 = vpop.f32.mrf.mxu1 }
 0x136   :  { %4419 = vst [vmem:[#allocation7_spill] sm:$0xff] %v3589_v8  ;;  %v548_v10 = vpop.f32.mrf.mxu0  ;;  %v583_v12 = vunpack.c.l.b16 %v3589_v8  ;;  %v584_v13 = vunpack.c.h.b16 %v3589_v8 }
 0x138   :  { %v3593_v14 = vpack.c.b16 %v583_v12, %v583_v12  ;;  %v3595_v15 = vpack.c.b16 %v584_v13, %v584_v13 }
 0x13a   :  { %v618_v16 = vsel %vm616_vm1, %v3593_v14, 0  ;;  %v3601_v17 = vsel %vm616_vm1, %v3595_v15, 0 }
 0x13b   :  { %4420 = vst [vmem:[#allocation8_spill] sm:$0xff] %v3601_v17  ;;  %v522_v18 = vpop.f32.mrf.mxu2  ;;  %636 = vmatpush.bf16.msrb.mxu2 %v618_v16  ;;  %685 = vmatpush.bf16.msra.mxu3 %v3601_v17 }
 0x13d   :  { %v559_v20 = vpop.f32.mrf.mxu1 }
 0x13e   :  { %v3606_v21 = vpack.c.bf16 %v559_v20, %v546_v6  ;;  %2717 = vmatmul.msk.bf16.vlgmr.msrb.gmra.mxu2 %vm591_vm2, %v3604_v19  ;;  %2725 = vmatmul.msk.bf16.vlgmr.msra.gmra.mxu3 %vm591_vm2, %v3604_v19 }
 0x13f   :  { %1053 = vmatpush.bf16.msra.mxu2 %v3108_v33  ;;  %1066 = vmatpush.bf16.msrb.mxu3 %v3116_v34 }
 0x140   :  { %4422 = vst [vmem:[#allocation10_spill] sm:$0xff] %v3606_v21  ;;  %v585_v22 = vunpack.c.l.b16 %v3606_v21  ;;  %v586_v23 = vunpack.c.h.b16 %v3606_v21 }
 0x142   :  { %v3614_v24 = vpack.c.b16 %v585_v22, %v585_v22  ;;  %v3616_v25 = vpack.c.b16 %v586_v23, %v586_v23 }
 0x143   :  { %1054 = vmatpush.bf16.msra.mxu2 %v3107_v35  ;;  %1067 = vmatpush.bf16.msrb.mxu3 %v3115_v36 }
 0x144   :  { %v624_v26 = vsel %vm616_vm1, %v3614_v24, 0  ;;  %v3622_v27 = vsel %vm616_vm1, %v3616_v25, 0 }
 0x145   :  { %4423 = vst [vmem:[#allocation11_spill] sm:$0xff] %v3622_v27  ;;  %v561_v28 = vpop.f32.mrf.mxu1  ;;  %734 = vmatpush.bf16.msra.mxu0 %v624_v26  ;;  %783 = vmatpush.bf16.msrb.mxu1 %v3622_v27 }
 0x147   :  { %1055 = vmatpush.bf16.msra.mxu2 %v3106_v37  ;;  %1068 = vmatpush.bf16.msrb.mxu3 %v3114_v38 }
 0x148   :  { %2733 = vmatmul.msk.bf16.vlgmr.msra.gmra.mxu0 %vm591_vm2, %v3604_v19  ;;  %2741 = vmatmul.msk.bf16.vlgmr.msrb.gmra.mxu1 %vm591_vm2, %v3604_v19 }
 0x149   :  { %1079 = vmatpush.bf16.msrb.mxu0 %v3124_v39  ;;  %1092 = vmatpush.bf16.msra.mxu1 %v3132_v40 }
 0x14b   :  { %1056 = vmatpush.bf16.msra.mxu2 %v3105_v41  ;;  %1069 = vmatpush.bf16.msrb.mxu3 %v3113_v42 }
 0x14d   :  { %1080 = vmatpush.bf16.msrb.mxu0 %v3123_v44  ;;  %1093 = vmatpush.bf16.msra.mxu1 %v3131_v45 }
 0x14e   :  { %2718 = vmatmul.msk.bf16.gmra.mxu2 %vm591_vm2, %v3629_v29  ;;  %2726 = vmatmul.msk.bf16.gmra.mxu3 %vm591_vm2, %v3629_v29 }
 0x14f   :  { %1057 = vmatpush.bf16.msra.mxu2 %v3104_v46  ;;  %1070 = vmatpush.bf16.msrb.mxu3 %v3112_v47 }
 0x151   :  { %1081 = vmatpush.bf16.msrb.mxu0 %v3122_v48  ;;  %1094 = vmatpush.bf16.msra.mxu1 %v3130_v49 }
 0x153   :  { %1058 = vmatpush.bf16.msra.mxu2 %v3103_v50  ;;  %1071 = vmatpush.bf16.msrb.mxu3 %v3111_v51 }
 0x155   :  { %1082 = vmatpush.bf16.msrb.mxu0 %v3121_v52  ;;  %1095 = vmatpush.bf16.msra.mxu1 %v3129_v53 }
 0x157   :  { %1059 = vmatpush.bf16.msra.mxu2 %v3102_v54  ;;  %1072 = vmatpush.bf16.msrb.mxu3 %v3110_v55 }
 0x158   :  { %2734 = vmatmul.msk.bf16.gmra.mxu0 %vm591_vm2, %v3629_v29  ;;  %2742 = vmatmul.msk.bf16.gmra.mxu1 %vm591_vm2, %v3629_v29 }
 0x159   :  { %1083 = vmatpush.bf16.msrb.mxu0 %v3120_v56  ;;  %1096 = vmatpush.bf16.msra.mxu1 %v3128_v57 }
 0x15b   :  { %1060 = vmatpush.bf16.msra.mxu2 %v3101_v58  ;;  %1073 = vmatpush.bf16.msrb.mxu3 %v3109_v59 }
 0x15d   :  { %1084 = vmatpush.bf16.msrb.mxu0 %v3119_v61  ;;  %1097 = vmatpush.bf16.msra.mxu1 %v3127_v62 }
 0x15e   :  { %2719 = vmatmul.msk.bf16.gmra.mxu2 %vm591_vm2, %v3639_v30  ;;  %2727 = vmatmul.msk.bf16.gmra.mxu3 %vm591_vm2, %v3639_v30 }
 0x161   :  { %1085 = vmatpush.bf16.msrb.mxu0 %v3118_v63  ;;  %1098 = vmatpush.bf16.msra.mxu1 %v3126_v0 }
 0x165   :  { %1086 = vmatpush.bf16.msrb.mxu0 %v3117_v1  ;;  %1099 = vmatpush.bf16.msra.mxu1 %v3125_v2 }
 0x168   :  { %2735 = vmatmul.msk.bf16.gmra.mxu0 %vm591_vm2, %v3639_v30  ;;  %2743 = vmatmul.msk.bf16.gmra.mxu1 %vm591_vm2, %v3639_v30  ;;  %v3249_v30 = vmov 1  }
 0x169   :  { %3172 = vset.pattern.permute.xlu0 %v3249_v30 }
 0x16e   :  { %2720 = vmatmul.msk.bf16.gmra.mxu2 %vm591_vm2, %v3649_v31  ;;  %2728 = vmatmul.msk.bf16.gmra.mxu3 %vm591_vm2, %v3649_v31 }
 0x178   :  { %2736 = vmatmul.msk.bf16.gmra.mxu0 %vm591_vm2, %v3649_v31  ;;  %2744 = vmatmul.msk.bf16.gmra.mxu1 %vm591_vm2, %v3649_v31  ;;  %v3248_v31 = vmov 2  }
 0x179   :  { %3174 = vset.pattern.permute.xlu2 %v3248_v31 }
 0x17e   :  { %2721 = vmatmul.msk.bf16.gmra.mxu2 %vm591_vm2, %v3659_v32  ;;  %2729 = vmatmul.msk.bf16.gmra.mxu3 %vm591_vm2, %v3659_v32 }
 0x188   :  { %2737 = vmatmul.msk.bf16.gmra.mxu0 %vm591_vm2, %v3659_v32  ;;  %2745 = vmatmul.msk.bf16.gmra.mxu1 %vm591_vm2, %v3659_v32 }
 0x18e   :  { %2722 = vmatmul.msk.bf16.gmra.mxu2 %vm591_vm2, %v3699_v43  ;;  %2730 = vmatmul.msk.bf16.gmra.mxu3 %vm591_vm2, %v3699_v43 }
 0x198   :  { %2738 = vmatmul.msk.bf16.gmra.mxu0 %vm591_vm2, %v3699_v43  ;;  %2746 = vmatmul.msk.bf16.gmra.mxu1 %vm591_vm2, %v3699_v43 }
 0x19e   :  { %2723 = vmatmul.msk.bf16.gmra.mxu2 %vm591_vm2, %v3757_v60  ;;  %2731 = vmatmul.msk.bf16.gmra.mxu3 %vm591_vm2, %v3757_v60 }
 0x1a8   :  { %2739 = vmatmul.msk.bf16.gmra.mxu0 %vm591_vm2, %v3757_v60  ;;  %2747 = vmatmul.msk.bf16.gmra.mxu1 %vm591_vm2, %v3757_v60 }
 0x1ae   :  { %2724 = vmatmul.msk.bf16.gmra.mxu2 %vm591_vm2, %v3785_v4  ;;  %2732 = vmatmul.msk.bf16.gmra.mxu3 %vm591_vm2, %v3785_v4 }
 0x1b8   :  { %2740 = vmatmul.msk.bf16.gmra.mxu0 %vm591_vm2, %v3785_v4  ;;  %2748 = vmatmul.msk.bf16.gmra.mxu1 %vm591_vm2, %v3785_v4 }
 0x1be   :  { %1061 = vmatmul.bf16.vlgmr.msra.gmra.mxu2 %v3593_v14  ;;  %1074 = vmatmul.bf16.vlgmr.msrb.gmra.mxu3 %v3595_v15 }
 0x1c1   :  { %v3797_v5 = vpop.f32.mrf.mxu2  ;;  %v3799_v6 = vpop.f32.mrf.mxu3 }
 0x1c2   :  { %4431 = vst [vmem:[#allocation19_spill] sm:$0xff] %v3797_v5 }
 0x1c3   :  { %4432 = vst [vmem:[#allocation20_spill] sm:$0xff] %v3799_v6 }
 0x1c5   :  { %v3801_v7 = vpop.f32.mrf.mxu0  ;;  %v3803_v9 = vpop.f32.mrf.mxu1 }
 0x1c6   :  { %4433 = vst [vmem:[#allocation21_spill] sm:$0xff] %v3801_v7 }
 0x1c7   :  { %4434 = vst [vmem:[#allocation22_spill] sm:$0xff] %v3803_v9 }
 0x1c8   :  { %1087 = vmatmul.bf16.vlgmr.msrb.gmra.mxu0 %v3614_v24  ;;  %1100 = vmatmul.bf16.vlgmr.msra.gmra.mxu1 %v3616_v25 }
 0x1c9   :  { %v3807_v10 = vpop.f32.mrf.mxu2  ;;  %v3809_v12 = vpop.f32.mrf.mxu3 }
 0x1ca   :  { %4435 = vst [vmem:[#allocation23_spill] sm:$0xff] %v3807_v10 }
 0x1cb   :  { %4436 = vst [vmem:[#allocation24_spill] sm:$0xff] %v3809_v12 }
 0x1cd   :  { %v3811_v13 = vpop.f32.mrf.mxu0  ;;  %v3813_v14 = vpop.f32.mrf.mxu1 }
 0x1ce   :  { %4437 = vst [vmem:[#allocation25_spill] sm:$0xff] %v3811_v13 }
 0x1cf   :  { %4438 = vst [vmem:[#allocation26_spill] sm:$0xff] %v3813_v14 }
 0x1d1   :  { %v3815_v15 = vpop.f32.mrf.mxu2  ;;  %v3817_v16 = vpop.f32.mrf.mxu3 }
 0x1d5   :  { %v3819_v18 = vpop.f32.mrf.mxu0  ;;  %v3821_v20 = vpop.f32.mrf.mxu1 }
 0x1d6   :  { %4439 = vst [vmem:[#allocation27_spill] sm:$0xff] %v3819_v18 }
 0x1d7   :  { %4440 = vst [vmem:[#allocation28_spill] sm:$0xff] %v3821_v20 }
 0x1d9   :  { %v3823_v22 = vpop.f32.mrf.mxu2  ;;  %v3825_v23 = vpop.f32.mrf.mxu3 }
 0x1dd   :  { %v3827_v24 = vpop.f32.mrf.mxu0  ;;  %v3829_v25 = vpop.f32.mrf.mxu1 }
 0x1de   :  { %4441 = vst [vmem:[#allocation29_spill] sm:$0xff] %v3827_v24 }
 0x1df   :  { %4442 = vst [vmem:[#allocation30_spill] sm:$0xff] %v3829_v25 }
 0x1e1   :  { %v3831_v26 = vpop.f32.mrf.mxu2  ;;  %v3833_v28 = vpop.f32.mrf.mxu3 }
 0x1e5   :  { %v3835_v33 = vpop.f32.mrf.mxu0  ;;  %v3837_v34 = vpop.f32.mrf.mxu1 }
 0x1e9   :  { %v3839_v35 = vpop.f32.mrf.mxu2  ;;  %v3841_v36 = vpop.f32.mrf.mxu3 }
 0x1ed   :  { %v3843_v37 = vpop.f32.mrf.mxu0  ;;  %v3845_v38 = vpop.f32.mrf.mxu1 }
 0x1f1   :  { %v3847_v39 = vpop.f32.mrf.mxu2  ;;  %v3849_v40 = vpop.f32.mrf.mxu3 }
 0x1f5   :  { %v3851_v41 = vpop.f32.mrf.mxu0  ;;  %v3853_v42 = vpop.f32.mrf.mxu1 }
 0x1f9   :  { %v3855_v44 = vpop.f32.mrf.mxu2  ;;  %v3857_v45 = vpop.f32.mrf.mxu3 }
 0x1fd   :  { %v3859_v46 = vpop.f32.mrf.mxu0  ;;  %v3861_v47 = vpop.f32.mrf.mxu1 }
 0x201   :  { %v3863_v48 = vpop.f32.mrf.mxu2  ;;  %v3865_v49 = vpop.f32.mrf.mxu3 }
 0x205   :  { %v3867_v50 = vpop.f32.mrf.mxu0  ;;  %v3869_v51 = vpop.f32.mrf.mxu1 }
 0x209   :  { %v3871_v52 = vpop.f32.mrf.mxu2  ;;  %v3873_v53 = vpop.f32.mrf.mxu3 }
 0x20d   :  { %v3875_v54 = vpop.f32.mrf.mxu0  ;;  %v3877_v55 = vpop.f32.mrf.mxu1 }
 0x211   :  { %v663_v56 = vpop.f32.mrf.mxu2  ;;  %v712_v57 = vpop.f32.mrf.mxu3 }
 0x215   :  { %v761_v58 = vpop.f32.mrf.mxu0  ;;  %v810_v59 = vpop.f32.mrf.mxu1 }
 0x219   :  { %v665_v61 = vpop.f32.mrf.mxu2  ;;  %v714_v62 = vpop.f32.mrf.mxu3 }
 0x21d   :  { %v763_v63 = vpop.f32.mrf.mxu0  ;;  %v812_v0 = vpop.f32.mrf.mxu1 }
 0x221   :  { %v668_v1 = vpop.f32.mrf.mxu2  ;;  %v717_v2 = vpop.f32.mrf.mxu3 }
 0x225   :  { %v766_v4 = vpop.f32.mrf.mxu0  ;;  %v815_v60 = vpop.f32.mrf.mxu1 }
 0x229   :  { %v670_v43 = vpop.f32.mrf.mxu2  ;;  %v719_v32 = vpop.f32.mrf.mxu3 }
 0x22a   :  { %v849_v10 = vpack.c.bf16 %v670_v43, %v668_v1  ;;  %v850_v5 = vpack.c.bf16 %v719_v32, %v717_v2  ;;  %v4457_v1 = vld [vmem:[#allocation5_spill] sm:$0xff] }
 0x22b   :  { %v67_v2 = vunpack.c.l.bf16 %v4457_v1 }
 0x22d   :  { %v768_v29 = vpop.f32.mrf.mxu0  ;;  %v817_v19 = vpop.f32.mrf.mxu1  ;;  %vm3933_vm3 = vcmp.gt.f32.partialorder %v67_v2, 0.0 }
 0x22e   :  { %v851_v18 = vpack.c.bf16 %v768_v29, %v766_v4  ;;  %v848_v29 = vpack.c.bf16 %v812_v0, %v810_v59  ;;  %v349_v4 = vld [vmem:[%s4396_s8] sm:$0xff] }
 0x22f   :  { %1106 = vst [vmem:[#allocation1] ss:$4 sm:$0xff] %v349_v4 }
 0x231   :  { %v673_v3 = vpop.f32.mrf.mxu2  ;;  %v722_v27 = vpop.f32.mrf.mxu3 }
 0x235   :  { %v771_v21 = vpop.f32.mrf.mxu0  ;;  %v820_v11 = vpop.f32.mrf.mxu1 }
 0x239   :  { %v675_v14 = vpop.f32.mrf.mxu2  ;;  %v724_v9 = vpop.f32.mrf.mxu3 }
 0x23a   :  { %v853_v13 = vpack.c.bf16 %v675_v14, %v673_v3  ;;  %v854_v7 = vpack.c.bf16 %v724_v9, %v722_v27  ;;  %v852_v3 = vpack.c.bf16 %v817_v19, %v815_v60  ;;  %v841_v19 = vpack.c.bf16 %v3871_v52, %v3863_v48  ;;  %v4455_v48 = vld [vmem:[#allocation22_spill] sm:$0xff]  ;;  %v1108_v52 = vld.sshfl [vmem:[#allocation1 + $0x8] sm:$0xff pattern:$0x73625140] }
 0x23b   :  { %v842_v60 = vpack.c.bf16 %v3873_v53, %v3865_v49  ;;  %v840_v14 = vpack.c.bf16 %v3861_v47, %v3853_v42  ;;  %v4456_v49 = vld [vmem:[#allocation26_spill] sm:$0xff] }
 0x23c   :  { %1115 = vmatpush.bf16.xpose.msrb.mxu2 %v853_v13  ;;  %1128 = vmatpush.bf16.xpose.msra.mxu3 %v854_v7  ;;  %v844_v7 = vpack.c.bf16 %v3877_v55, %v3869_v51  ;;  %v839_v13 = vpack.c.bf16 %v3859_v46, %v3851_v41  ;;  %v4446_v41 = vld [vmem:[#allocation30_spill] sm:$0xff]  ;;  %v4454_v46 = vld [vmem:[#allocation25_spill] sm:$0xff]  ;;  %v1107_v51 = vld.sshfl [vmem:[#allocation1] sm:$0xff pattern:$0x73625140] }
 0x23d   :  { %v773_v17 = vpop.f32.mrf.mxu0  ;;  %v822_v8 = vpop.f32.mrf.mxu1  ;;  %v1109_v53 = vld.sshfl [vmem:[#allocation1 + $0x10] sm:$0xff pattern:$0x73625140] }
 0x23e   :  { %v855_v12 = vpack.c.bf16 %v773_v17, %v771_v21  ;;  %v856_v6 = vpack.c.bf16 %v822_v8, %v820_v11  ;;  %v845_v8 = vpack.c.bf16 %v665_v61, %v663_v56  ;;  %v846_v21 = vpack.c.bf16 %v714_v62, %v712_v57 }
 0x240   :  { %1141 = vmatpush.bf16.xpose.msra.mxu0 %v855_v12  ;;  %1154 = vmatpush.bf16.xpose.msrb.mxu1 %v856_v6  ;;  %v843_v6 = vpack.c.bf16 %v3875_v54, %v3867_v50  ;;  %v838_v12 = vpack.c.bf16 %v3857_v45, %v3849_v40  ;;  %v830_v40 = vpack.c.bf16 %v3825_v23, %v3817_v16  ;;  %v4453_v23 = vld [vmem:[#allocation21_spill] sm:$0xff]  ;;  %v1110_v54 = vld.sshfl [vmem:[#allocation1 + $0x18] sm:$0xff pattern:$0x73625140] }
 0x241   :  { %v1062_v31 = vpop.f32.mrf.mxu2  ;;  %v1075_v30 = vpop.f32.mrf.mxu3  ;;  %v827_v47 = vpack.c.bf16 %v4454_v46, %v4453_v23  ;;  %v828_v50 = vpack.c.bf16 %v4456_v49, %v4455_v48  ;;  %v79_v46 = vld [vmem:[%s4390_s2 + $0x50] sm:$0xff]  ;;  %v77_v48 = vld [vmem:[%s4390_s2 + $0x40] sm:$0xff]  ;;  %v78_v49 = vld [vmem:[%s4390_s2 + $0x48] sm:$0xff] }
 0x242   :  { %v1076_v25 = vadd.f32 %v1075_v30, %v1062_v31 }
 0x244   :  { %1116 = vmatpush.bf16.xpose.msrb.mxu2 %v849_v10  ;;  %1129 = vmatpush.bf16.xpose.msra.mxu3 %v850_v5  ;;  %v847_v5 = vpack.c.bf16 %v763_v63, %v761_v58  ;;  %v837_v10 = vpack.c.bf16 %v3855_v44, %v3847_v39  ;;  %v829_v39 = vpack.c.bf16 %v3823_v22, %v3815_v15  ;;  %v4450_v44 = vld [vmem:[#allocation24_spill] sm:$0xff]  ;;  %v4451_v15 = vld [vmem:[#allocation7_spill] sm:$0xff] }
 0x245   :  { %v1088_v20 = vpop.f32.mrf.mxu0  ;;  %v1101_v24 = vpop.f32.mrf.mxu1  ;;  %v1253_v16 = vsel %vm616_vm1, %v4451_v15, 0  ;;  %v4452_v22 = vld [vmem:[#allocation8_spill] sm:$0xff] }
 0x246   :  { %v1089_v27 = vadd.f32 %v1088_v20, %v1076_v25  ;;  %v834_v20 = vpack.c.bf16 %v3841_v36, %v3833_v28  ;;  %v836_v25 = vpack.c.bf16 %v3845_v38, %v3837_v34  ;;  %v4444_v28 = vld [vmem:[#allocation29_spill] sm:$0xff]  ;;  %v4445_v36 = vld [vmem:[#allocation28_spill] sm:$0xff]  ;;  %v4448_v34 = vld [vmem:[#allocation23_spill] sm:$0xff] }
 0x247   :  { %v832_v42 = vpack.c.bf16 %v4446_v41, %v4445_v36  ;;  %v4449_v38 = vld [vmem:[#allocation20_spill] sm:$0xff] }
 0x248   :  { %v3879_v9 = vadd.f32 %v1101_v24, %v1089_v27  ;;  %1142 = vmatpush.bf16.xpose.msra.mxu0 %v851_v18  ;;  %1155 = vmatpush.bf16.xpose.msrb.mxu1 %v852_v3  ;;  %v833_v18 = vpack.c.bf16 %v3839_v35, %v3831_v26  ;;  %v835_v24 = vpack.c.bf16 %v3843_v37, %v3835_v33  ;;  %v4443_v26 = vld [vmem:[#allocation27_spill] sm:$0xff] }
 0x249   :  { %v1064_v17 = vpop.f32.mrf.mxu2  ;;  %v1077_v11 = vpop.f32.mrf.mxu3  ;;  %v831_v35 = vpack.c.bf16 %v4444_v28, %v4443_v26  ;;  %v4447_v33 = vld [vmem:[#allocation19_spill] sm:$0xff]  ;;  %v826_v45 = vpack.c.bf16 %v4450_v44, %v4449_v38  ;;  %v82_v38 = vld [vmem:[%s4390_s2 + $0x68] sm:$0xff] }
 0x24a   :  { %1592 = vperm.xlu2 %3174, %v3879_v9   ;;  %1409 = vperm.xlu0 %3172, %v3879_v9   ;;  %v825_v37 = vpack.c.bf16 %v4448_v34, %v4447_v33  ;;  %v84_v26 = vld [vmem:[%s4390_s2 + $0x78] sm:$0xff] }
 0x24c   :  { %1117 = vmatpush.bf16.xpose.msrb.mxu2 %v845_v8  ;;  %1130 = vmatpush.bf16.xpose.msra.mxu3 %v846_v21 }
 0x24d   :  { %v1090_v32 = vpop.f32.mrf.mxu0  ;;  %v1103_v43 = vpop.f32.mrf.mxu1 }
 0x250   :  { %1143 = vmatpush.bf16.xpose.msra.mxu0 %v847_v5  ;;  %1156 = vmatpush.bf16.xpose.msrb.mxu1 %v848_v29 }
 0x254   :  { %1118 = vmatpush.bf16.xpose.msrb.mxu2 %v841_v19  ;;  %1131 = vmatpush.bf16.xpose.msra.mxu3 %v842_v60 }
 0x258   :  { %1144 = vmatpush.bf16.xpose.msra.mxu0 %v843_v6  ;;  %1157 = vmatpush.bf16.xpose.msrb.mxu1 %v844_v7 }
 0x25c   :  { %1119 = vmatpush.bf16.xpose.msrb.mxu2 %v837_v10  ;;  %1132 = vmatpush.bf16.xpose.msra.mxu3 %v838_v12 }
 0x260   :  { %1145 = vmatpush.bf16.xpose.msra.mxu0 %v839_v13  ;;  %1158 = vmatpush.bf16.xpose.msrb.mxu1 %v840_v14 }
 0x264   :  { %1120 = vmatpush.bf16.xpose.msrb.mxu2 %v833_v18  ;;  %1133 = vmatpush.bf16.xpose.msra.mxu3 %v834_v20  ;;  %v83_v18 = vld [vmem:[%s4390_s2 + $0x70] sm:$0xff] }
 0x268   :  { %1146 = vmatpush.bf16.xpose.msra.mxu0 %v835_v24  ;;  %1159 = vmatpush.bf16.xpose.msrb.mxu1 %v836_v25  ;;  %v3250_v24 = vmov 0  }
 0x269   :  { %3175 = vset.pattern.permute.xlu2 %v3250_v24  ;;  %3194 = vset.pattern.permute.xlu0 %v3250_v24 }
 0x26a   :  { %1376 = vperm.xlu2 %3175, %v83_v18  }
 0x26c   :  { %1121 = vmatpush.bf16.xpose.msrb.mxu2 %v829_v39  ;;  %1134 = vmatpush.bf16.xpose.msra.mxu3 %v830_v40 }
 0x270   :  { %1147 = vmatpush.bf16.xpose.msra.mxu0 %v831_v35  ;;  %1160 = vmatpush.bf16.xpose.msrb.mxu1 %v832_v42  ;;  %v81_v35 = vld [vmem:[%s4390_s2 + $0x60] sm:$0xff] }
 0x272   :  { %1381 = vperm.xlu2 %3175, %v84_v26  }
 0x274   :  { %1122 = vmatpush.bf16.xpose.msrb.mxu2 %v825_v37  ;;  %1135 = vmatpush.bf16.xpose.msra.mxu3 %v826_v45 }
 0x278   :  { %1148 = vmatpush.bf16.xpose.msra.mxu0 %v827_v47  ;;  %1161 = vmatpush.bf16.xpose.msrb.mxu1 %v828_v50  ;;  %v80_v47 = vld [vmem:[%s4390_s2 + $0x58] sm:$0xff]  ;;  %v75_v50 = vld [vmem:[%s4390_s2 + $0x30] sm:$0xff] }
 0x27a   :  { %1366 = vperm.xlu2 %3175, %v81_v35  }
 0x27b   :  { %1123 = vmatmul.bf16.vlgmr.msrb.gmra.mxu2 %v1107_v51  ;;  %1136 = vmatmul.bf16.vlgmr.msra.gmra.mxu3 %v1108_v52  ;;  %v76_v51 = vld [vmem:[%s4390_s2 + $0x38] sm:$0xff]  ;;  %v73_v52 = vld [vmem:[%s4390_s2 + $0x20] sm:$0xff] }
 0x27c   :  { %1262 = vmatpush.bf16.msra.mxu2 %v1253_v16  ;;  %1499 = vmatpush.bf16.msrb.mxu3 %v4452_v22 }
 0x27f   :  { %1149 = vmatmul.bf16.vlgmr.msra.gmra.mxu0 %v1109_v53  ;;  %1162 = vmatmul.bf16.vlgmr.msrb.gmra.mxu1 %v1110_v54  ;;  %v74_v53 = vld [vmem:[%s4390_s2 + $0x28] sm:$0xff]  ;;  %v71_v54 = vld [vmem:[%s4390_s2 + $0x10] sm:$0xff] }
 0x282   :  { %1371 = vperm.xlu2 %3175, %v82_v38  }
 0x28a   :  { %1356 = vperm.xlu2 %3175, %v79_v46  }
 0x292   :  { %1361 = vperm.xlu2 %3175, %v80_v47  }
 0x29a   :  { %1346 = vperm.xlu2 %3175, %v77_v48  }
 0x2a2   :  { %1351 = vperm.xlu2 %3175, %v78_v49  }
 0x2aa   :  { %1336 = vperm.xlu2 %3175, %v75_v50  }
 0x2b2   :  { %1341 = vperm.xlu2 %3175, %v76_v51  }
 0x2ba   :  { %1326 = vperm.xlu2 %3175, %v73_v52  }
 0x2bc   :  { %v1410_v31 = vpop.permute.xlu0 %1409 }
 0x2c2   :  { %1331 = vperm.xlu2 %3175, %v74_v53  }
 0x2ca   :  { %1316 = vperm.xlu2 %3175, %v71_v54  }
 0x2fc   :  { %v1150_v55 = vpop.f32.mrf.mxu0  ;;  %v1163_v56 = vpop.f32.mrf.mxu1 }
 0x2fe   :  { %v1124_v57 = vpop.f32.mrf.mxu2  ;;  %v1137_v58 = vpop.f32.mrf.mxu3 }
 0x2ff   :  { %v1138_v59 = vadd.f32 %v1137_v58, %v1124_v57  ;;  %v69_v57 = vld [vmem:[%s4390_s2] sm:$0xff] }
 0x301   :  { %v1151_v61 = vadd.f32 %v1150_v55, %v1138_v59  ;;  %v70_v59 = vld [vmem:[%s4390_s2 + $0x8] sm:$0xff] }
 0x303   :  { %v3929_v62 = vadd.f32 %v1163_v56, %v1151_v61  ;;  %v72_v56 = vld [vmem:[%s4390_s2 + $0x18] sm:$0xff] }
 0x304   :  { %v1152_v63 = vpop.f32.mrf.mxu0  ;;  %v1165_v0 = vpop.f32.mrf.mxu1  ;;  %1321 = vperm.xlu2 %3175, %v72_v56  }
 0x305   :  { %v1412_v30 = vperm.slane %v3929_v62, 1  ;;  %v1595_v2 = vperm.slane %v3929_v62, 2 }
 0x306   :  { %v1126_v3 = vpop.f32.mrf.mxu2  ;;  %v1139_v27 = vpop.f32.mrf.mxu3 }
 0x307   :  { %v1413_v17 = vadd.f32 %v1412_v30, %v1410_v31  ;;  %v1593_v31 = vpop.permute.xlu2 %1592 }
 0x308   :  { %v1596_v30 = vadd.f32 %v1595_v2, %v1593_v31 }
 0x309   :  { %v1415_v8 = vmul.f32 0.2, %v1413_v17  ;;  %vm1414_vm4 = vcmp.ge.f32.partialorder %v1413_v17, 0.0 }
 0x30a   :  { %v1598_v3 = vmul.f32 0.2, %v1596_v30  ;;  %vm1597_vm9 = vcmp.ge.f32.partialorder %v1596_v30, 0.0 }
 0x30b   :  { %v1416_v21 = vsel %vm1414_vm4, %v1413_v17, %v1415_v8 }
 0x30c   :  { %v1417_v32 = vsel %vm3933_vm3, %v1416_v21, -1e+30  ;;  %1306 = vperm.xlu2 %3175, %v69_v57   ;;  %v1599_v27 = vsel %vm1597_vm9, %v1596_v30, %v1598_v3 }
 0x30d   :  { %v1418_v43 = vrot.slane %v1417_v32, 4  ;;  %v1600_v8 = vsel %vm3933_vm3, %v1599_v27, -1e+30 }
 0x30e   :  { %v1601_v21 = vrot.slane %v1600_v8, 4 }
 0x30f   :  { %v1419_v5 = vmax.f32 %v1417_v32, %v1418_v43 }
 0x311   :  { %v1420_v29 = vrot.slane %v1419_v5, 2 }
 0x313   :  { %v1421_v19 = vmax.f32 %v1419_v5, %v1420_v29 }
 0x314   :  { %1311 = vperm.xlu2 %3175, %v70_v59  }
 0x315   :  { %v1422_v60 = vrot.slane %v1421_v19, 1 }
 0x317   :  { %v1423_v4 = vmax.f32 %v1421_v19, %v1422_v60 }
 0x319   :  { %v1424_v6 = vsub.f32 %v1417_v32, %v1423_v4  ;;  %v1602_v32 = vmax.f32 %v1600_v8, %v1601_v21 }
 0x31b   :  { %v1425_v7 = vmul.f32 1.442695, %v1424_v6  ;;  %v1603_v43 = vrot.slane %v1602_v32, 2  ;;  %v4004_v6 = vpop.permute.xlu2 %1376 }
 0x31d   :  { %3196 = vpow2.f32 %v1425_v7  ;;  %v1604_v29 = vmax.f32 %v1602_v32, %v1603_v43 }
 0x31f   :  { %v1605_v19 = vrot.slane %v1604_v29, 1 }
 0x321   :  { %v1606_v60 = vmax.f32 %v1604_v29, %v1605_v19 }
 0x323   :  { %v3197_v10 = vpop.eup %3196  ;;  %v1607_v4 = vsub.f32 %v1600_v8, %v1606_v60 }
 0x324   :  { %v1427_v12 = vsel %vm3933_vm3, %v3197_v10, 0.0 }
 0x325   :  { %v1428_v13 = vrot.slane %v1427_v12, 4  ;;  %v1608_v7 = vmul.f32 1.442695, %v1607_v4 }
 0x327   :  { %v1429_v14 = vadd.f32 %v1428_v13, %v1427_v12 }
 0x329   :  { %v1430_v20 = vrot.slane %v1429_v14, 2 }
 0x32b   :  { %v1431_v25 = vadd.f32 %v1430_v20, %v1429_v14  ;;  %v1172_v20 = vperm.slane %v3929_v62, 0 }
 0x32d   :  { %v1432_v39 = vrot.slane %v1431_v25, 1 }
 0x32f   :  { %v1433_v40 = vadd.f32 %v1432_v39, %v1431_v25 }
 0x331   :  { %v1434_v28 = vmax.f32 %v1433_v40, 1e-30 }
 0x333   :  { %3198 = vrcp.f32 %v1434_v28  ;;  %v1446_v33 = vand.u32 2147483648, %v1434_v28  ;;  %v1444_v37 = vand.u32 2147483647, %v1434_v28  ;;  %vm1440_vm6 = vweird.f32 %v1434_v28 }
 0x334   :  { %3200 = vpow2.f32 %v1608_v7 }
 0x335   :  { %v1447_v45 = vor.u32 1.1754944e-38, %v1446_v33  ;;  %vm1445_vm8 = vcmp.eq.f32.partialorder %v1444_v37, 8.507059e+37 }
 0x339   :  { %v3199_v36 = vpop.eup %3198 }
 0x33a   :  { %v1436_v41 = vmul.f32 %v3199_v36, %v1434_v28  ;;  %vm1441_vm5 = vweird.f32 %v3199_v36  ;;  %v3201_v13 = vpop.eup %3200 }
 0x33b   :  { %vm1442_vm7 = vmor %vm1440_vm6, %vm1441_vm5  ;;  %v4014_v18 = vsel %vm3933_vm3, %v3201_v13, 0.0 }
 0x33c   :  { %v1437_v42 = vsub.f32 1.0, %v1436_v41  ;;  %v1611_v39 = vrot.slane %v4014_v18, 4 }
 0x33e   :  { %v1438_v34 = vmul.f32 %v3199_v36, %v1437_v42 }
 0x340   :  { %v1439_v44 = vadd.f32 %v3199_v36, %v1438_v34 }
 0x342   :  { %v1443_v15 = vsel %vm1442_vm7, %v3199_v36, %v1439_v44  ;;  %v1612_v36 = vadd.f32 %v1611_v39, %v4014_v18 }
 0x343   :  { %v1448_v16 = vsel %vm1445_vm8, %v1447_v45, %v1443_v15 }
 0x344   :  { %v1450_v22 = vmul.f32 %v1448_v16, %v1427_v12  ;;  %v4008_v12 = vpop.permute.xlu2 %1381  ;;  %v1613_v34 = vrot.slane %v1612_v36, 2 }
 0x346   :  { %v3953_v23 = vpack.c.bf16 %v1450_v22, %v1450_v22  ;;  %v1614_v15 = vadd.f32 %v1613_v34, %v1612_v36 }
 0x348   :  { %1452 = vxpose.xlu1.c.b16.start.end [1/1] (short) %v3953_v23, 128  ;;  %v1615_v46 = vrot.slane %v1614_v15, 1 }
 0x34a   :  { %v1616_v50 = vadd.f32 %v1615_v46, %v1614_v15 }
 0x34c   :  { %v4018_v40 = vpop.permute.xlu2 %1366  ;;  %v1617_v52 = vmax.f32 %v1616_v50, 1e-30 }
 0x34e   :  { %v1629_v43 = vand.u32 2147483648, %v1617_v52  ;;  %vm1623_vm12 = vweird.f32 %v1617_v52  ;;  %v1627_v60 = vand.u32 2147483647, %v1617_v52 }
 0x350   :  { %vm1628_vm15 = vcmp.eq.f32.partialorder %v1627_v60, 8.507059e+37 }
 0x354   :  { %v4025_v38 = vpop.permute.xlu2 %1371 }
 0x35c   :  { %v4031_v51 = vpop.permute.xlu2 %1356 }
 0x364   :  { %v4037_v57 = vpop.permute.xlu2 %1361 }
 0x36c   :  { %v4041_v30 = vpop.permute.xlu2 %1346 }
 0x39b   :  { %3173 = vset.pattern.permute.xlu1 %v3250_v24 }
 0x3f4   :  { %v1460_v55 = vpop.trf.xlu1 }
 0x3f5   :  { %2885 = vmatmul.msk.bf16.vlgmr.msrb.gmra.mxu3 %vm591_vm2, %v1460_v55 }
 0x404   :  { %v1461_v58 = vpop.trf.xlu1 }
 0x405   :  { %2886 = vmatmul.msk.bf16.gmra.mxu3 %vm591_vm2, %v1461_v58 }
 0x412   :  { %1169 = vperm.xlu1 %3173, %v3879_v9  }
 0x414   :  { %v1462_v61 = vpop.trf.xlu1 }
 0x415   :  { %2887 = vmatmul.msk.bf16.gmra.mxu3 %vm591_vm2, %v1462_v61 }
 0x424   :  { %v1463_v63 = vpop.trf.xlu1 }
 0x425   :  { %2888 = vmatmul.msk.bf16.gmra.mxu3 %vm591_vm2, %v1463_v63 }
 0x434   :  { %v1464_v0 = vpop.trf.xlu1 }
 0x435   :  { %2889 = vmatmul.msk.bf16.gmra.mxu3 %vm591_vm2, %v1464_v0 }
 0x444   :  { %v1465_v1 = vpop.trf.xlu1 }
 0x445   :  { %2890 = vmatmul.msk.bf16.gmra.mxu3 %vm591_vm2, %v1465_v1 }
 0x454   :  { %v1466_v17 = vpop.trf.xlu1 }
 0x455   :  { %2891 = vmatmul.msk.bf16.gmra.mxu3 %vm591_vm2, %v1466_v17 }
 0x464   :  { %v1467_v5 = vpop.trf.xlu1 }
 0x465   :  { %2892 = vmatmul.msk.bf16.gmra.mxu3 %vm591_vm2, %v1467_v5  ;;  %v4043_v5 = vpop.permute.xlu2 %1351 }
 0x46d   :  { %v4046_v34 = vpop.permute.xlu2 %1336 }
 0x478   :  { %v4006_v10 = vpop.f32.mrf.mxu3 }
 0x480   :  { %v4010_v14 = vpop.f32.mrf.mxu3 }
 0x484   :  { %v1170_v24 = vpop.permute.xlu1 %1169 }
 0x485   :  { %v1173_v25 = vadd.f32 %v1172_v20, %v1170_v24  ;;  %v1630_v20 = vor.u32 1.1754944e-38, %v1629_v43 }
 0x487   :  { %vm1174_vm10 = vcmp.ge.f32.partialorder %v1173_v25, 0.0  ;;  %v1175_v26 = vmul.f32 0.2, %v1173_v25 }
 0x488   :  { %v4020_v28 = vpop.f32.mrf.mxu3 }
 0x489   :  { %v1176_v35 = vsel %vm1174_vm10, %v1173_v25, %v1175_v26 }
 0x48a   :  { %v1177_v41 = vsel %vm3933_vm3, %v1176_v35, -1e+30 }
 0x48b   :  { %v1178_v42 = vrot.slane %v1177_v41, 4 }
 0x48d   :  { %v1179_v33 = vmax.f32 %v1177_v41, %v1178_v42 }
 0x48f   :  { %v1180_v37 = vrot.slane %v1179_v33, 2 }
 0x490   :  { %v4027_v44 = vpop.f32.mrf.mxu3 }
 0x491   :  { %v1181_v45 = vmax.f32 %v1179_v33, %v1180_v37 }
 0x493   :  { %v1182_v16 = vrot.slane %v1181_v45, 1 }
 0x495   :  { %v1183_v22 = vmax.f32 %v1181_v45, %v1182_v16 }
 0x497   :  { %v1184_v47 = vsub.f32 %v1177_v41, %v1183_v22  ;;  %v4054_v22 = vpop.permute.xlu2 %1341 }
 0x498   :  { %v4029_v48 = vpop.f32.mrf.mxu3 }
 0x499   :  { %v1185_v49 = vmul.f32 1.442695, %v1184_v47 }
 0x49b   :  { %3202 = vpow2.f32 %v1185_v49 }
 0x49c   :  { %3204 = vrcp.f32 %v1617_v52 }
 0x49f   :  { %v4056_v47 = vpop.permute.xlu2 %1326 }
 0x4a0   :  { %v4033_v53 = vpop.f32.mrf.mxu3 }
 0x4a1   :  { %v3203_v54 = vpop.eup %3202 }
 0x4a2   :  { %v1187_v55 = vsel %vm3933_vm3, %v3203_v54, 0.0  ;;  %v3205_v59 = vpop.eup %3204 }
 0x4a3   :  { %v1188_v56 = vrot.slane %v1187_v55, 4  ;;  %v1619_v1 = vmul.f32 %v3205_v59, %v1617_v52  ;;  %vm1624_vm11 = vweird.f32 %v3205_v59 }
 0x4a4   :  { %vm1625_vm13 = vmor %vm1623_vm12, %vm1624_vm11 }
 0x4a5   :  { %v1189_v58 = vadd.f32 %v1188_v56, %v1187_v55  ;;  %v1620_v3 = vsub.f32 1.0, %v1619_v1 }
 0x4a7   :  { %v1190_v61 = vrot.slane %v1189_v58, 2  ;;  %v1621_v8 = vmul.f32 %v3205_v59, %v1620_v3  ;;  %v4058_v50 = vpop.permute.xlu2 %1331 }
 0x4a8   :  { %v4039_v63 = vpop.f32.mrf.mxu3 }
 0x4a9   :  { %v1191_v0 = vadd.f32 %v1190_v61, %v1189_v58  ;;  %v1622_v21 = vadd.f32 %v3205_v59, %v1621_v8  ;;  %v1547_v60 = vmul.f32 %v4039_v63, %v4046_v34 }
 0x4ab   :  { %v1192_v2 = vrot.slane %v1191_v0, 1  ;;  %v1626_v7 = vsel %vm1625_vm13, %v3205_v59, %v1622_v21 }
 0x4ac   :  { %v1631_v39 = vsel %vm1628_vm15, %v1630_v20, %v1626_v7 }
 0x4ad   :  { %v1193_v31 = vadd.f32 %v1192_v2, %v1191_v0  ;;  %v1633_v42 = vmul.f32 %v1631_v39, %v4014_v18  ;;  %v4460_v39 = vld [vmem:[#allocation10_spill] sm:$0xff] }
 0x4af   :  { %v1194_v27 = vmax.f32 %v1193_v31, 1e-30  ;;  %v4050_v15 = vpack.c.bf16 %v1633_v42, %v1633_v42  ;;  %v4060_v54 = vpop.permute.xlu2 %1316 }
 0x4b0   :  { %v1518_v17 = vpop.f32.mrf.mxu3 }
 0x4b1   :  { %3206 = vrcp.f32 %v1194_v27  ;;  %v1206_v13 = vand.u32 2147483648, %v1194_v27  ;;  %v1204_v25 = vand.u32 2147483647, %v1194_v27  ;;  %vm1200_vm0 = vweird.f32 %v1194_v27 }
 0x4b2   :  { %v1548_v43 = vmul.f32 %v1518_v17, %v4054_v22  ;;  %v1543_v17 = vmul.f32 %v4020_v28, %v4060_v54 }
 0x4b3   :  { %v1207_v35 = vor.u32 1.1754944e-38, %v1206_v13  ;;  %vm1205_vm5 = vcmp.eq.f32.partialorder %v1204_v25, 8.507059e+37  ;;  %v1545_v13 = vmul.f32 %v4029_v48, %v4056_v47 }
 0x4b4   :  { %v1560_v7 = vpack.c.bf16 %v1548_v43, %v1547_v60 }
 0x4b7   :  { %v3207_v32 = vpop.eup %3206  ;;  %v4065_v0 = vpop.permute.xlu2 %1321 }
 0x4b8   :  { %v1521_v29 = vpop.f32.mrf.mxu3  ;;  %v1196_v19 = vmul.f32 %v3207_v32, %v1194_v27  ;;  %vm1201_vm14 = vweird.f32 %v3207_v32 }
 0x4b9   :  { %vm1202_vm4 = vmor %vm1200_vm0, %vm1201_vm14  ;;  %v1549_v21 = vmul.f32 %v1521_v29, %v4041_v30  ;;  %v1544_v29 = vmul.f32 %v4027_v44, %v4065_v0  ;;  %v1676_v44 = vsel %vm616_vm1, %v4460_v39, 0 }
 0x4ba   :  { %v1197_v4 = vsub.f32 1.0, %v1196_v19 }
 0x4bb   :  { %v1558_v63 = vpack.c.bf16 %v1544_v29, %v1543_v17 }
 0x4bc   :  { %v1198_v24 = vmul.f32 %v3207_v32, %v1197_v4  ;;  %v1546_v4 = vmul.f32 %v4033_v53, %v4058_v50 }
 0x4be   :  { %v1199_v26 = vadd.f32 %v3207_v32, %v1198_v24  ;;  %v1559_v20 = vpack.c.bf16 %v1546_v4, %v1545_v13 }
 0x4c0   :  { %v1523_v36 = vpop.f32.mrf.mxu3  ;;  %v1203_v41 = vsel %vm1202_vm4, %v3207_v32, %v1199_v26  ;;  %v4072_v32 = vpop.permute.xlu2 %1306 }
 0x4c1   :  { %v1208_v33 = vsel %vm1205_vm5, %v1207_v35, %v1203_v41  ;;  %v1550_v27 = vmul.f32 %v1523_v36, %v4043_v5  ;;  %v1541_v25 = vmul.f32 %v4006_v10, %v4072_v32  ;;  %v3251_v10 = vmov 3  }
 0x4c2   :  { %v1210_v37 = vmul.f32 %v1208_v33, %v1187_v55 }
 0x4c3   :  { %v1561_v19 = vpack.c.bf16 %v1550_v27, %v1549_v21  ;;  %v1769_v27 = vperm.slane %v3929_v62, 3 }
 0x4c4   :  { %v4048_v45 = vpack.c.bf16 %v1210_v37, %v1210_v37 }
 0x4c6   :  { %3176 = vxpose.binary.xlu2.c.b16.start.end [1/2] (short) %v4050_v15, %v4048_v45, 128 }
 0x4c8   :  { %v1526_v16 = vpop.f32.mrf.mxu3  ;;  %v4083_v24 = vpop.permute.xlu2 %1311 }
 0x4c9   :  { %v1551_v3 = vmul.f32 %v1526_v16, %v4031_v51  ;;  %v1542_v53 = vmul.f32 %v4010_v14, %v4083_v24 }
 0x4cb   :  { %v1557_v48 = vpack.c.bf16 %v1542_v53, %v1541_v25 }
 0x4d0   :  { %v1528_v46 = vpop.f32.mrf.mxu3 }
 0x4d1   :  { %v1552_v2 = vmul.f32 %v1528_v46, %v4037_v57 }
 0x4d3   :  { %v1562_v8 = vpack.c.bf16 %v1552_v2, %v1551_v3 }
 0x4d8   :  { %v1531_v49 = vpop.f32.mrf.mxu3 }
 0x4d9   :  { %v1553_v1 = vmul.f32 %v1531_v49, %v4018_v40 }
 0x4e0   :  { %v1533_v18 = vpop.f32.mrf.mxu3 }
 0x4e1   :  { %v1554_v59 = vmul.f32 %v1533_v18, %v4025_v38 }
 0x4e3   :  { %v1563_v31 = vpack.c.bf16 %v1554_v59, %v1553_v1 }
 0x4e8   :  { %v1536_v52 = vpop.f32.mrf.mxu3 }
 0x4e9   :  { %v1555_v56 = vmul.f32 %v1536_v52, %v4004_v6 }
 0x4f0   :  { %v1538_v55 = vpop.f32.mrf.mxu3 }
 0x4f1   :  { %v1556_v58 = vmul.f32 %v1538_v55, %v4008_v12 }
 0x4f3   :  { %v1564_v61 = vpack.c.bf16 %v1556_v58, %v1555_v56 }
 0x4f5   :  { %1565 = vmatpush.bf16.msrb.mxu0 %v1564_v61 }
 0x4f9   :  { %1566 = vmatpush.bf16.msrb.mxu0 %v1563_v31 }
 0x4fd   :  { %1567 = vmatpush.bf16.msrb.mxu0 %v1562_v8 }
 0x501   :  { %1568 = vmatpush.bf16.msrb.mxu0 %v1561_v19 }
 0x505   :  { %1569 = vmatpush.bf16.msrb.mxu0 %v1560_v7 }
 0x509   :  { %1570 = vmatpush.bf16.msrb.mxu0 %v1559_v20 }
 0x50d   :  { %1571 = vmatpush.bf16.msrb.mxu0 %v1558_v63 }
 0x511   :  { %1572 = vmatpush.bf16.msrb.mxu0 %v1557_v48 }
 0x514   :  { %1573 = vmatmul.bf16.vlgmr.msrb.gmra.mxu0 %v3953_v23 }
 0x515   :  { %1685 = vmatpush.bf16.msra.mxu0 %v1676_v44 }
 0x528   :  { %3193 = vset.pattern.permute.xlu2 %v3251_v10 }
 0x567   :  { %v3177_v26 = vpop.trf.xlu2 }
 0x568   :  { %2877 = vmatmul.msk.bf16.vlgmr.msra.gmra.mxu2 %vm591_vm2, %v3177_v26 }
 0x56f   :  { %v3178_v28 = vpop.trf.xlu2 }
 0x570   :  { %2893 = vmatmul.msk.bf16.vlgmr.msra.gmra.mxu0 %vm591_vm2, %v3178_v28 }
 0x577   :  { %v3179_v35 = vpop.trf.xlu2 }
 0x578   :  { %2878 = vmatmul.msk.bf16.gmra.mxu2 %vm591_vm2, %v3179_v35 }
 0x57f   :  { %v3180_v14 = vpop.trf.xlu2 }
 0x580   :  { %2894 = vmatmul.msk.bf16.gmra.mxu0 %vm591_vm2, %v3180_v14 }
 0x587   :  { %v3181_v36 = vpop.trf.xlu2 }
 0x588   :  { %2879 = vmatmul.msk.bf16.gmra.mxu2 %vm591_vm2, %v3181_v36 }
 0x58f   :  { %v3182_v41 = vpop.trf.xlu2 }
 0x590   :  { %2895 = vmatmul.msk.bf16.gmra.mxu0 %vm591_vm2, %v3182_v41 }
 0x591   :  { %v4100_v23 = vpop.f32.mrf.mxu0 }
 0x597   :  { %v3183_v42 = vpop.trf.xlu2 }
 0x598   :  { %2880 = vmatmul.msk.bf16.gmra.mxu2 %vm591_vm2, %v3183_v42 }
 0x599   :  { %v1576_v33 = vpop.f32.mrf.mxu0 }
 0x59f   :  { %1766 = vperm.xlu2 %3193, %v3879_v9   ;;  %v3184_v37 = vpop.trf.xlu2 }
 0x5a0   :  { %2896 = vmatmul.msk.bf16.gmra.mxu0 %vm591_vm2, %v3184_v37 }
 0x5a7   :  { %v3185_v16 = vpop.trf.xlu2 }
 0x5a8   :  { %2881 = vmatmul.msk.bf16.gmra.mxu2 %vm591_vm2, %v3185_v16 }
 0x5af   :  { %v3186_v46 = vpop.trf.xlu2 }
 0x5b0   :  { %2897 = vmatmul.msk.bf16.gmra.mxu0 %vm591_vm2, %v3186_v46 }
 0x5b7   :  { %v3187_v49 = vpop.trf.xlu2 }
 0x5b8   :  { %2882 = vmatmul.msk.bf16.gmra.mxu2 %vm591_vm2, %v3187_v49 }
 0x5bf   :  { %v3188_v18 = vpop.trf.xlu2 }
 0x5c0   :  { %2898 = vmatmul.msk.bf16.gmra.mxu0 %vm591_vm2, %v3188_v18 }
 0x5c7   :  { %v3189_v52 = vpop.trf.xlu2 }
 0x5c8   :  { %2883 = vmatmul.msk.bf16.gmra.mxu2 %vm591_vm2, %v3189_v52 }
 0x5cf   :  { %v3190_v55 = vpop.trf.xlu2 }
 0x5d0   :  { %2899 = vmatmul.msk.bf16.gmra.mxu0 %vm591_vm2, %v3190_v55 }
 0x5d7   :  { %v3191_v9 = vpop.trf.xlu2 }
 0x5d8   :  { %2884 = vmatmul.msk.bf16.gmra.mxu2 %vm591_vm2, %v3191_v9 }
 0x5df   :  { %v3192_v56 = vpop.trf.xlu2 }
 0x5e0   :  { %2900 = vmatmul.msk.bf16.gmra.mxu0 %vm591_vm2, %v3192_v56 }
 0x5eb   :  { %v4113_v58 = vpop.f32.mrf.mxu2 }
 0x5ed   :  { %v1687_v59 = vpop.f32.mrf.mxu0 }
 0x5ee   :  { %v4118_v2 = vmul.f32 %v1687_v59, %v4072_v32 }
 0x5f3   :  { %v4115_v61 = vpop.f32.mrf.mxu2 }
 0x5f5   :  { %v1689_v1 = vpop.f32.mrf.mxu0 }
 0x5f6   :  { %v4121_v31 = vmul.f32 %v1689_v1, %v4083_v24 }
 0x5f9   :  { %v1767_v8 = vpop.permute.xlu2 %1766 }
 0x5fa   :  { %v1770_v21 = vadd.f32 %v1769_v27, %v1767_v8 }
 0x5fb   :  { %v4126_v43 = vpop.f32.mrf.mxu2 }
 0x5fc   :  { %vm1771_vm6 = vcmp.ge.f32.partialorder %v1770_v21, 0.0  ;;  %v1772_v19 = vmul.f32 0.2, %v1770_v21 }
 0x5fd   :  { %v1692_v60 = vpop.f32.mrf.mxu0 }
 0x5fe   :  { %v1773_v4 = vsel %vm1771_vm6, %v1770_v21, %v1772_v19  ;;  %v4133_v62 = vmul.f32 %v1692_v60, %v4060_v54 }
 0x5ff   :  { %v1774_v7 = vsel %vm3933_vm3, %v1773_v4, -1e+30 }
 0x600   :  { %v1775_v13 = vrot.slane %v1774_v7, 4 }
 0x602   :  { %v1776_v29 = vmax.f32 %v1774_v7, %v1775_v13 }
 0x603   :  { %v4130_v20 = vpop.f32.mrf.mxu2 }
 0x604   :  { %v1777_v17 = vrot.slane %v1776_v29, 2 }
 0x605   :  { %v1694_v63 = vpop.f32.mrf.mxu0 }
 0x606   :  { %v1778_v25 = vmax.f32 %v1776_v29, %v1777_v17  ;;  %v4136_v53 = vmul.f32 %v1694_v63, %v4065_v0 }
 0x608   :  { %v1779_v48 = vrot.slane %v1778_v25, 1  ;;  %v1744_v39 = vpack.c.bf16 %v4136_v53, %v4133_v62 }
 0x60a   :  { %v1780_v44 = vmax.f32 %v1778_v25, %v1779_v48 }
 0x60b   :  { %v4140_v26 = vpop.f32.mrf.mxu2 }
 0x60c   :  { %v1781_v28 = vsub.f32 %v1774_v7, %v1780_v44 }
 0x60d   :  { %v1697_v35 = vpop.f32.mrf.mxu0 }
 0x60e   :  { %v1782_v10 = vmul.f32 1.442695, %v1781_v28  ;;  %v4145_v42 = vmul.f32 %v1697_v35, %v4056_v47 }
 0x610   :  { %3208 = vpow2.f32 %v1782_v10 }
 0x613   :  { %v4142_v14 = vpop.f32.mrf.mxu2 }
 0x615   :  { %v1699_v36 = vpop.f32.mrf.mxu0 }
 0x616   :  { %v3209_v41 = vpop.eup %3208  ;;  %v4148_v33 = vmul.f32 %v1699_v36, %v4058_v50 }
 0x617   :  { %v1784_v37 = vsel %vm3933_vm3, %v3209_v41, 0.0 }
 0x618   :  { %v1745_v16 = vpack.c.bf16 %v4148_v33, %v4145_v42  ;;  %v1785_v46 = vrot.slane %v1784_v37, 4 }
 0x61a   :  { %v1786_v49 = vadd.f32 %v1785_v46, %v1784_v37 }
 0x61b   :  { %v1279_v18 = vpop.f32.mrf.mxu2 }
 0x61c   :  { %v1787_v52 = vrot.slane %v1786_v49, 2 }
 0x61d   :  { %v1702_v55 = vpop.f32.mrf.mxu0 }
 0x61e   :  { %v1788_v9 = vadd.f32 %v1787_v52, %v1786_v49  ;;  %v4155_v21 = vmul.f32 %v1702_v55, %v4046_v34 }
 0x620   :  { %v1789_v56 = vrot.slane %v1788_v9, 1 }
 0x622   :  { %v1790_v59 = vadd.f32 %v1789_v56, %v1788_v9 }
 0x623   :  { %v1281_v1 = vpop.f32.mrf.mxu2 }
 0x624   :  { %v1791_v27 = vmax.f32 %v1790_v59, 1e-30 }
 0x625   :  { %v1704_v8 = vpop.f32.mrf.mxu0 }
 0x626   :  { %v4158_v19 = vmul.f32 %v1704_v8, %v4054_v22  ;;  %3210 = vrcp.f32 %v1791_v27  ;;  %v1803_v17 = vand.u32 2147483648, %v1791_v27  ;;  %v1801_v25 = vand.u32 2147483647, %v1791_v27 }
 0x627   :  { %vm1797_vm8 = vweird.f32 %v1791_v27 }
 0x628   :  { %v1746_v60 = vpack.c.bf16 %v4158_v19, %v4155_v21  ;;  %v1804_v28 = vor.u32 1.1754944e-38, %v1803_v17  ;;  %vm1802_vm10 = vcmp.eq.f32.partialorder %v1801_v25, 8.507059e+37  ;;  %v85_v21 = vld [vmem:[%s4391_s3] sm:$0xff] }
 0x629   :  { %v1936_v19 = vmul.f32 0.25, %v85_v21 }
 0x62b   :  { %v1284_v4 = vpop.f32.mrf.mxu2  ;;  %1939 = vperm.xlu0 %3194, %v1936_v19  }
 0x62c   :  { %v3211_v7 = vpop.eup %3210 }
 0x62d   :  { %v1793_v13 = vmul.f32 %v3211_v7, %v1791_v27  ;;  %vm1798_vm7 = vweird.f32 %v3211_v7  ;;  %v4162_v10 = vpop.f32.mrf.mxu0 }
 0x62e   :  { %vm1799_vm9 = vmor %vm1797_vm8, %vm1798_vm7 }
 0x62f   :  { %v1794_v29 = vsub.f32 1.0, %v1793_v13 }
 0x631   :  { %v1795_v63 = vmul.f32 %v3211_v7, %v1794_v29 }
 0x633   :  { %v1286_v48 = vpop.f32.mrf.mxu2  ;;  %v1796_v44 = vadd.f32 %v3211_v7, %v1795_v63 }
 0x635   :  { %v1800_v35 = vsel %vm1799_vm9, %v3211_v7, %v1796_v44  ;;  %v1709_v52 = vpop.f32.mrf.mxu0 }
 0x636   :  { %v1805_v36 = vsel %vm1802_vm10, %v1804_v28, %v1800_v35 }
 0x637   :  { %v1807_v41 = vmul.f32 %v1805_v36, %v1784_v37 }
 0x639   :  { %v4164_v46 = vpack.c.bf16 %v1807_v41, %v1807_v41  ;;  %v1393_v41 = vmul.f32 %v4043_v5, %v1286_v48  ;;  %v1387_v48 = vmul.f32 %v4065_v0, %v4130_v20 }
 0x63b   :  { %1809 = vxpose.xlu1.c.b16.start.end [1/1] (short) %v4164_v46, 128  ;;  %v1289_v49 = vpop.f32.mrf.mxu2 }
 0x63c   :  { %v1394_v36 = vmul.f32 %v4031_v51, %v1289_v49  ;;  %v1388_v49 = vmul.f32 %v4056_v47, %v4140_v26 }
 0x63d   :  { %v1712_v9 = vpop.f32.mrf.mxu0 }
 0x643   :  { %v1291_v55 = vpop.f32.mrf.mxu2 }
 0x644   :  { %v1395_v28 = vmul.f32 %v4037_v57, %v1291_v55  ;;  %v1389_v55 = vmul.f32 %v4058_v50, %v4142_v14 }
 0x645   :  { %v1714_v8 = vpop.f32.mrf.mxu0 }
 0x646   :  { %v1405_v3 = vpack.c.bf16 %v1395_v28, %v1394_v36  ;;  %v1737_v36 = vmul.f32 %v1712_v9, %v4031_v51 }
 0x64b   :  { %v1294_v56 = vpop.f32.mrf.mxu2 }
 0x64c   :  { %v1396_v25 = vmul.f32 %v4018_v40, %v1294_v56  ;;  %v1390_v56 = vmul.f32 %v4046_v34, %v1279_v18  ;;  %v1385_v18 = vmul.f32 %v4083_v24, %v4115_v61 }
 0x64d   :  { %v1717_v13 = vpop.f32.mrf.mxu0 }
 0x653   :  { %v1296_v59 = vpop.f32.mrf.mxu2 }
 0x654   :  { %v1397_v37 = vmul.f32 %v4025_v38, %v1296_v59 }
 0x655   :  { %v1719_v44 = vpop.f32.mrf.mxu0 }
 0x656   :  { %v1406_v35 = vpack.c.bf16 %v1397_v37, %v1396_v25  ;;  %v1740_v20 = vmul.f32 %v1719_v44, %v4025_v38 }
 0x65b   :  { %v1299_v27 = vpop.f32.mrf.mxu2 }
 0x65c   :  { %v1398_v7 = vmul.f32 %v4004_v6, %v1299_v27  ;;  %v1392_v27 = vmul.f32 %v4041_v30, %v1284_v4  ;;  %v1402_v4 = vpack.c.bf16 %v1389_v55, %v1388_v49 }
 0x65e   :  { %v1404_v59 = vpack.c.bf16 %v1393_v41, %v1392_v27  ;;  %v1735_v27 = vmul.f32 %v4162_v10, %v4041_v30  ;;  %v4462_v10 = vld [vmem:[#allocation11_spill] sm:$0xff] }
 0x663   :  { %v1301_v29 = vpop.f32.mrf.mxu2 }
 0x664   :  { %v1399_v17 = vmul.f32 %v4008_v12, %v1301_v29  ;;  %v1391_v29 = vmul.f32 %v4054_v22, %v1281_v1 }
 0x666   :  { %v1407_v63 = vpack.c.bf16 %v1399_v17, %v1398_v7  ;;  %v1722_v7 = vpop.f32.mrf.mxu0  ;;  %v1403_v17 = vpack.c.bf16 %v1391_v29, %v1390_v56 }
 0x667   :  { %v1741_v26 = vmul.f32 %v1722_v7, %v4004_v6 }
 0x668   :  { %1578 = vmatpush.bf16.msra.mxu1 %v1407_v63  ;;  %v1384_v63 = vmul.f32 %v4072_v32, %v4113_v58  ;;  %v1736_v58 = vmul.f32 %v1709_v52, %v4043_v5 }
 0x66a   :  { %v1400_v25 = vpack.c.bf16 %v1385_v18, %v1384_v63  ;;  %v1747_v44 = vpack.c.bf16 %v1736_v58, %v1735_v27 }
 0x66c   :  { %1579 = vmatpush.bf16.msra.mxu1 %v1406_v35  ;;  %v1738_v35 = vmul.f32 %v1714_v8, %v4037_v57 }
 0x66e   :  { %v1724_v1 = vpop.f32.mrf.mxu0  ;;  %v1748_v41 = vpack.c.bf16 %v1738_v35, %v1737_v36 }
 0x66f   :  { %v1742_v14 = vmul.f32 %v1724_v1, %v4008_v12 }
 0x670   :  { %1580 = vmatpush.bf16.msra.mxu1 %v1405_v3  ;;  %v1386_v3 = vmul.f32 %v4060_v54, %v4126_v43  ;;  %v1739_v43 = vmul.f32 %v1717_v13, %v4018_v40 }
 0x671   :  { %v1750_v28 = vpack.c.bf16 %v1742_v14, %v1741_v26 }
 0x672   :  { %v1401_v37 = vpack.c.bf16 %v1387_v48, %v1386_v3  ;;  %v1749_v61 = vpack.c.bf16 %v1740_v20, %v1739_v43 }
 0x674   :  { %1581 = vmatpush.bf16.msra.mxu1 %v1404_v59 }
 0x678   :  { %1582 = vmatpush.bf16.msra.mxu1 %v1403_v17 }
 0x67c   :  { %1583 = vmatpush.bf16.msra.mxu1 %v1402_v4 }
 0x680   :  { %1584 = vmatpush.bf16.msra.mxu1 %v1401_v37 }
 0x684   :  { %1585 = vmatpush.bf16.msra.mxu1 %v1400_v25 }
 0x687   :  { %1586 = vmatmul.bf16.vlgmr.msra.gmra.mxu1 %v4048_v45  ;;  %v4461_v45 = vpack.c.bf16 %v4121_v31, %v4118_v2 }
 0x688   :  { %1751 = vmatpush.bf16.msrb.mxu1 %v1750_v28 }
 0x68c   :  { %1752 = vmatpush.bf16.msrb.mxu1 %v1749_v61 }
 0x690   :  { %1753 = vmatpush.bf16.msrb.mxu1 %v1748_v41 }
 0x694   :  { %1754 = vmatpush.bf16.msrb.mxu1 %v1747_v44 }
 0x698   :  { %1755 = vmatpush.bf16.msrb.mxu1 %v1746_v60 }
 0x69c   :  { %1756 = vmatpush.bf16.msrb.mxu1 %v1745_v16 }
 0x6a0   :  { %1757 = vmatpush.bf16.msrb.mxu1 %v1744_v39 }
 0x6a4   :  { %1758 = vmatpush.bf16.msrb.mxu1 %v4461_v45 }
 0x6a7   :  { %1759 = vmatmul.bf16.vlgmr.msrb.gmra.mxu1 %v4050_v15 }
 0x6a8   :  { %1856 = vmatpush.bf16.msra.mxu1 %v4462_v10 }
 0x6e7   :  { %v1817_v60 = vpop.trf.xlu1 }
 0x6e8   :  { %2901 = vmatmul.msk.bf16.vlgmr.msra.gmra.mxu1 %vm591_vm2, %v1817_v60  ;;  %v3140_v60 = vld [vmem:[%s4397_s9 + $0x38] sm:$0xff] }
 0x6e9   :  { %2032 = vmatpush.bf16.msra.mxu3 %v3140_v60  ;;  %v4468_v60 = vld [vmem:[#allocation15_spill] sm:$0xff] }
 0x6f7   :  { %v1818_v42 = vpop.trf.xlu1 }
 0x6f8   :  { %2902 = vmatmul.msk.bf16.gmra.mxu1 %vm591_vm2, %v1818_v42 }
 0x704   :  { %v1587_v62 = vpop.f32.mrf.mxu1 }
 0x705   :  { %2353 = vperm.xlu1 %3173, %v85_v21   ;;  %v1588_v15 = vadd.f32 %v1587_v62, %v4100_v23  ;;  %v3139_v62 = vld [vmem:[%s4397_s9 + $0x30] sm:$0xff] }
 0x706   :  { %2033 = vmatpush.bf16.msra.mxu3 %v3139_v62  ;;  %v4470_v62 = vld [vmem:[#allocation17_spill] sm:$0xff] }
 0x707   :  { %v1819_v2 = vpop.trf.xlu1 }
 0x708   :  { %2903 = vmatmul.msk.bf16.gmra.mxu1 %vm591_vm2, %v1819_v2 }
 0x70c   :  { %v1589_v31 = vpop.f32.mrf.mxu1 }
 0x717   :  { %v1820_v53 = vpop.trf.xlu1 }
 0x718   :  { %2904 = vmatmul.msk.bf16.gmra.mxu1 %vm591_vm2, %v1820_v53 }
 0x724   :  { %v1760_v39 = vpop.f32.mrf.mxu1 }
 0x725   :  { %v4221_v33 = vadd.f32 %v1760_v39, %v1588_v15  ;;  %v3138_v15 = vld [vmem:[%s4397_s9 + $0x28] sm:$0xff] }
 0x726   :  { %2034 = vmatpush.bf16.msra.mxu3 %v3138_v15 }
 0x727   :  { %v1821_v16 = vpop.trf.xlu1 }
 0x728   :  { %2905 = vmatmul.msk.bf16.gmra.mxu1 %vm591_vm2, %v1821_v16 }
 0x72c   :  { %v1762_v52 = vpop.f32.mrf.mxu1 }
 0x737   :  { %v1822_v9 = vpop.trf.xlu1 }
 0x738   :  { %2906 = vmatmul.msk.bf16.gmra.mxu1 %vm591_vm2, %v1822_v9  ;;  %v3137_v9 = vld [vmem:[%s4397_s9 + $0x20] sm:$0xff] }
 0x739   :  { %2035 = vmatpush.bf16.msra.mxu3 %v3137_v9 }
 0x747   :  { %v1823_v8 = vpop.trf.xlu1 }
 0x748   :  { %2907 = vmatmul.msk.bf16.gmra.mxu1 %vm591_vm2, %v1823_v8 }
 0x757   :  { %v1824_v13 = vpop.trf.xlu1 }
 0x758   :  { %2908 = vmatmul.msk.bf16.gmra.mxu1 %vm591_vm2, %v1824_v13  ;;  %v3136_v13 = vld [vmem:[%s4397_s9 + $0x18] sm:$0xff] }
 0x759   :  { %2036 = vmatpush.bf16.msra.mxu3 %v3136_v13 }
 0x765   :  { %v1858_v29 = vpop.f32.mrf.mxu1 }
 0x766   :  { %v1898_v23 = vmul.f32 %v1858_v29, %v4072_v32  ;;  %v3135_v29 = vld [vmem:[%s4397_s9 + $0x10] sm:$0xff] }
 0x767   :  { %2037 = vmatpush.bf16.msra.mxu3 %v3135_v29 }
 0x76d   :  { %v1860_v59 = vpop.f32.mrf.mxu1 }
 0x76e   :  { %v1899_v7 = vmul.f32 %v1860_v59, %v4083_v24  ;;  %v3134_v59 = vld [vmem:[%s4397_s9 + $0x8] sm:$0xff] }
 0x76f   :  { %2038 = vmatpush.bf16.msra.mxu3 %v3134_v59 }
 0x770   :  { %v1914_v56 = vpack.c.bf16 %v1899_v7, %v1898_v23  ;;  %v3133_v23 = vld [vmem:[%s4397_s9] sm:$0xff]  ;;  %v3147_v7 = vld [vmem:[%s4398_s10 + $0x30] sm:$0xff] }
 0x773   :  { %2039 = vmatpush.bf16.msra.mxu3 %v3133_v23 }
 0x775   :  { %v1863_v55 = vpop.f32.mrf.mxu1 }
 0x776   :  { %v1900_v49 = vmul.f32 %v1863_v55, %v4060_v54  ;;  %v3145_v55 = vld [vmem:[%s4398_s10 + $0x20] sm:$0xff] }
 0x77d   :  { %v1865_v17 = vpop.f32.mrf.mxu1 }
 0x77e   :  { %v1901_v48 = vmul.f32 %v1865_v17, %v4065_v0  ;;  %v3144_v17 = vld [vmem:[%s4398_s10 + $0x18] sm:$0xff] }
 0x780   :  { %v1915_v4 = vpack.c.bf16 %v1901_v48, %v1900_v49  ;;  %v1940_v48 = vpop.permute.xlu0 %1939 }
 0x785   :  { %v1868_v3 = vpop.f32.mrf.mxu1 }
 0x786   :  { %v1902_v18 = vmul.f32 %v1868_v3, %v4056_v47  ;;  %v4287_v3 = vld [vmem:[%s4400_s12] sm:$0xff] }
 0x78d   :  { %v1870_v1 = vpop.f32.mrf.mxu1 }
 0x78e   :  { %v1903_v37 = vmul.f32 %v1870_v1, %v4058_v50  ;;  %v1943_v1 = vperm.slane %v4287_v3, 3 }
 0x790   :  { %v1916_v14 = vpack.c.bf16 %v1903_v37, %v1902_v18  ;;  %v3143_v18 = vld [vmem:[%s4398_s10 + $0x10] sm:$0xff] }
 0x795   :  { %v1873_v63 = vpop.f32.mrf.mxu1 }
 0x796   :  { %v1904_v25 = vmul.f32 %v1873_v63, %v4046_v34 }
 0x79d   :  { %v1875_v26 = vpop.f32.mrf.mxu1 }
 0x79e   :  { %v1905_v20 = vmul.f32 %v1875_v26, %v4054_v22  ;;  %v1948_v26 = vperm.slane %v4287_v3, 5 }
 0x7a0   :  { %v1917_v28 = vpack.c.bf16 %v1905_v20, %v1904_v25  ;;  %v4463_v25 = vld [vmem:[#allocation6_spill] sm:$0xff] }
 0x7a5   :  { %v1878_v43 = vpop.f32.mrf.mxu1 }
 0x7a6   :  { %v1906_v52 = vmul.f32 %v1878_v43, %v4041_v30 }
 0x7ad   :  { %v1880_v35 = vpop.f32.mrf.mxu1 }
 0x7ae   :  { %v1907_v39 = vmul.f32 %v1880_v35, %v4043_v5 }
 0x7b0   :  { %v1918_v8 = vpack.c.bf16 %v1907_v39, %v1906_v52 }
 0x7b5   :  { %v1883_v61 = vpop.f32.mrf.mxu1 }
 0x7b6   :  { %v1908_v53 = vmul.f32 %v1883_v61, %v4031_v51 }
 0x7bd   :  { %v1885_v36 = vpop.f32.mrf.mxu1 }
 0x7be   :  { %v1909_v2 = vmul.f32 %v1885_v36, %v4037_v57  ;;  %v3141_v36 = vld [vmem:[%s4398_s10] sm:$0xff] }
 0x7c0   :  { %v1919_v16 = vpack.c.bf16 %v1909_v2, %v1908_v53  ;;  %v4471_v2 = vld [vmem:[#allocation18_spill] sm:$0xff] }
 0x7c5   :  { %v1888_v58 = vpop.f32.mrf.mxu1 }
 0x7c6   :  { %v1910_v42 = vmul.f32 %v1888_v58, %v4018_v40 }
 0x7cd   :  { %v1890_v41 = vpop.f32.mrf.mxu1 }
 0x7ce   :  { %v1911_v21 = vmul.f32 %v1890_v41, %v4025_v38 }
 0x7d0   :  { %v1920_v31 = vpack.c.bf16 %v1911_v21, %v1910_v42  ;;  %v4466_v21 = vld [vmem:[#allocation13_spill] sm:$0xff]  ;;  %v4469_v42 = vld [vmem:[#allocation16_spill] sm:$0xff] }
 0x7d5   :  { %v1893_v27 = vpop.f32.mrf.mxu1 }
 0x7d6   :  { %v1912_v45 = vmul.f32 %v1893_v27, %v4004_v6 }
 0x7dd   :  { %v1895_v44 = vpop.f32.mrf.mxu1 }
 0x7de   :  { %v1913_v10 = vmul.f32 %v1895_v44, %v4008_v12  ;;  %v4464_v44 = vld [vmem:[#allocation9_spill] sm:$0xff] }
 0x7e0   :  { %v1921_v19 = vpack.c.bf16 %v1913_v10, %v1912_v45  ;;  %v4465_v10 = vld [vmem:[#allocation12_spill] sm:$0xff] }
 0x7e2   :  { %1922 = vmatpush.bf16.msrb.mxu2 %v1921_v19  ;;  %v4467_v19 = vld [vmem:[#allocation14_spill] sm:$0xff] }
 0x7e6   :  { %1923 = vmatpush.bf16.msrb.mxu2 %v1920_v31 }
 0x7ea   :  { %1924 = vmatpush.bf16.msrb.mxu2 %v1919_v16 }
 0x7ee   :  { %1925 = vmatpush.bf16.msrb.mxu2 %v1918_v8 }
 0x7f2   :  { %1926 = vmatpush.bf16.msrb.mxu2 %v1917_v28 }
 0x7f6   :  { %1927 = vmatpush.bf16.msrb.mxu2 %v1916_v14  ;;  %v1946_v14 = vperm.slane %v4287_v3, 4 }
 0x7fa   :  { %1928 = vmatpush.bf16.msrb.mxu2 %v1915_v4 }
 0x7fe   :  { %1929 = vmatpush.bf16.msrb.mxu2 %v1914_v56  ;;  %v3146_v56 = vld [vmem:[%s4398_s10 + $0x28] sm:$0xff] }
 0x801   :  { %1930 = vmatmul.bf16.vlgmr.msrb.gmra.mxu2 %v4164_v46  ;;  %v3148_v46 = vld [vmem:[%s4398_s10 + $0x38] sm:$0xff] }
 0x802   :  { %2154 = vmatpush.bf16.msrb.mxu3 %v3148_v46 }
 0x806   :  { %2155 = vmatpush.bf16.msrb.mxu3 %v3147_v7 }
 0x80a   :  { %2156 = vmatpush.bf16.msrb.mxu3 %v3146_v56 }
 0x80e   :  { %2157 = vmatpush.bf16.msrb.mxu3 %v3145_v55 }
 0x812   :  { %2158 = vmatpush.bf16.msrb.mxu3 %v3144_v17 }
 0x816   :  { %2159 = vmatpush.bf16.msrb.mxu3 %v3143_v18 }
 0x884   :  { %v1931_v49 = vpop.f32.mrf.mxu2 }
 0x885   :  { %v1935_v4 = vadd.f32 %v1931_v49, %v4221_v33  ;;  %v3142_v33 = vld [vmem:[%s4398_s10 + $0x8] sm:$0xff] }
 0x886   :  { %2160 = vmatpush.bf16.msrb.mxu3 %v3142_v33 }
 0x887   :  { %v1942_v37 = vmul.f32 %v1940_v48, %v1935_v4 }
 0x889   :  { %v1944_v63 = vadd.f32 %v1943_v1, %v1942_v37 }
 0x88a   :  { %2161 = vmatpush.bf16.msrb.mxu3 %v3141_v36 }
 0x88b   :  { %v1945_v20 = vadd.f32 %v1944_v63, %v4463_v25 }
 0x88c   :  { %v1933_v28 = vpop.f32.mrf.mxu2 }
 0x88d   :  { %v1947_v43 = vmul.f32 %v1946_v14, %v1945_v20 }
 0x88f   :  { %v4299_v35 = vadd.f32 %v1948_v26, %v1947_v43  ;;  %v1982_v26 = vld [vmem:[%s4399_s11] sm:$0x1] }
 0x891   :  { %v1983_v61 = vpack.c.bf16 %v4299_v35, %v4299_v35 }
 0x893   :  { %2040 = vmatmul.bf16.vlgmr.msra.gmra.mxu3 %v1983_v61 }
 0x916   :  { %v2041_v58 = vpop.f32.mrf.mxu3 }
 0x917   :  { %v2045_v41 = vpack.c.bf16 %v2041_v58, %v2041_v58 }
 0x919   :  { %v2047_v27 = vsel %vm616_vm1, %v2045_v41, 0  ;;  %2162 = vmatmul.bf16.vlgmr.msrb.gmra.mxu3 %v2045_v41 }
 0x91a   :  { %2056 = vmatpush.bf16.msra.mxu2 %v2047_v27  ;;  %2272 = vmatpush.bf16.msra.mxu3 %v2047_v27 }
 0x91d   :  { %2941 = vmatmul.msk.bf16.vlgmr.msra.gmra.mxu2 %vm591_vm2, %v4464_v44 }
 0x91e   :  { %v2043_v45 = vpop.f32.mrf.mxu3 }
 0x92d   :  { %2942 = vmatmul.msk.bf16.gmra.mxu2 %vm591_vm2, %v4465_v10 }
 0x93d   :  { %2943 = vmatmul.msk.bf16.gmra.mxu2 %vm591_vm2, %v4466_v21 }
 0x94d   :  { %2944 = vmatmul.msk.bf16.gmra.mxu2 %vm591_vm2, %v4467_v19 }
 0x95d   :  { %2945 = vmatmul.msk.bf16.gmra.mxu2 %vm591_vm2, %v4468_v60 }
 0x96d   :  { %2946 = vmatmul.msk.bf16.gmra.mxu2 %vm591_vm2, %v4469_v42 }
 0x97d   :  { %2947 = vmatmul.msk.bf16.gmra.mxu2 %vm591_vm2, %v4470_v62 }
 0x98d   :  { %2948 = vmatmul.msk.bf16.gmra.mxu2 %vm591_vm2, %v4471_v2 }
 0x99c   :  { %v2163_v31 = vpop.f32.mrf.mxu3 }
 0x99d   :  { %2182 = vperm.xlu0 %3194, %v2163_v31  }
 0x9a0   :  { %v2058_v53 = vpop.f32.mrf.mxu2 }
 0x9a4   :  { %v2165_v15 = vpop.f32.mrf.mxu3 }
 0x9a8   :  { %v2060_v39 = vpop.f32.mrf.mxu2 }
 0x9a9   :  { %v2098_v16 = vpack.c.bf16 %v2060_v39, %v2058_v53 }
 0x9b0   :  { %v2063_v52 = vpop.f32.mrf.mxu2 }
 0x9b8   :  { %v2065_v9 = vpop.f32.mrf.mxu2 }
 0x9b9   :  { %v2099_v8 = vpack.c.bf16 %v2065_v9, %v2063_v52 }
 0x9c0   :  { %v2068_v13 = vpop.f32.mrf.mxu2 }
 0x9c8   :  { %v2070_v29 = vpop.f32.mrf.mxu2 }
 0x9c9   :  { %v2100_v59 = vpack.c.bf16 %v2070_v29, %v2068_v13 }
 0x9d0   :  { %v2073_v23 = vpop.f32.mrf.mxu2 }
 0x9d8   :  { %v2075_v46 = vpop.f32.mrf.mxu2 }
 0x9d9   :  { %v2101_v7 = vpack.c.bf16 %v2075_v46, %v2073_v23 }
 0x9e0   :  { %v2078_v56 = vpop.f32.mrf.mxu2 }
 0x9e8   :  { %v2080_v55 = vpop.f32.mrf.mxu2 }
 0x9e9   :  { %v2102_v17 = vpack.c.bf16 %v2080_v55, %v2078_v56 }
 0x9f0   :  { %v2083_v49 = vpop.f32.mrf.mxu2 }
 0x9f8   :  { %v2085_v48 = vpop.f32.mrf.mxu2 }
 0x9f9   :  { %v2103_v33 = vpack.c.bf16 %v2085_v48, %v2083_v49 }
 0xa00   :  { %v2088_v4 = vpop.f32.mrf.mxu2 }
 0xa08   :  { %v2090_v1 = vpop.f32.mrf.mxu2 }
 0xa09   :  { %v2104_v63 = vpack.c.bf16 %v2090_v1, %v2088_v4 }
 0xa0f   :  { %v2183_v28 = vpop.permute.xlu0 %2182 }
 0xa10   :  { %v2093_v18 = vpop.f32.mrf.mxu2 }
 0xa18   :  { %v2095_v37 = vpop.f32.mrf.mxu2 }
 0xa19   :  { %v2105_v14 = vpack.c.bf16 %v2095_v37, %v2093_v18 }
 0xa1b   :  { %2167 = vmatpush.bf16.xpose.msrb.mxu0 %v2105_v14 }
 0xa23   :  { %2168 = vmatpush.bf16.xpose.msrb.mxu0 %v2104_v63 }
 0xa2b   :  { %2169 = vmatpush.bf16.xpose.msrb.mxu0 %v2103_v33 }
 0xa33   :  { %2170 = vmatpush.bf16.xpose.msrb.mxu0 %v2102_v17 }
 0xa3b   :  { %2171 = vmatpush.bf16.xpose.msrb.mxu0 %v2101_v7 }
 0xa43   :  { %2172 = vmatpush.bf16.xpose.msrb.mxu0 %v2100_v59 }
 0xa4b   :  { %2173 = vmatpush.bf16.xpose.msrb.mxu0 %v2099_v8 }
 0xa53   :  { %2174 = vmatpush.bf16.xpose.msrb.mxu0 %v2098_v16 }
 0xa5a   :  { %2175 = vmatmul.bf16.vlgmr.msrb.gmra.mxu0 %v1982_v26 }
 0xad7   :  { %v2176_v25 = vpop.f32.mrf.mxu0 }
 0xad8   :  { %v2185_v20 = vperm.slane %v2176_v25, 0 }
 0xada   :  { %v2186_v43 = vadd.f32 %v2185_v20, %v2183_v28 }
 0xadc   :  { %vm2187_vm1 = vcmp.ge.f32.partialorder %v2186_v43, 0.0  ;;  %v2188_v61 = vmul.f32 0.2, %v2186_v43 }
 0xade   :  { %v2189_v36 = vsel %vm2187_vm1, %v2186_v43, %v2188_v61 }
 0xadf   :  { %v2190_v58 = vsel %vm3933_vm3, %v2189_v36, -1e+30  ;;  %v2178_v41 = vpop.f32.mrf.mxu0 }
 0xae0   :  { %v2191_v27 = vrot.slane %v2190_v58, 4 }
 0xae2   :  { %v2192_v44 = vmax.f32 %v2190_v58, %v2191_v27 }
 0xae4   :  { %v2193_v45 = vrot.slane %v2192_v44, 2 }
 0xae6   :  { %v2194_v10 = vmax.f32 %v2192_v44, %v2193_v45 }
 0xae8   :  { %v2195_v21 = vrot.slane %v2194_v10, 1 }
 0xaea   :  { %v2196_v19 = vmax.f32 %v2194_v10, %v2195_v21 }
 0xaec   :  { %v2197_v60 = vsub.f32 %v2190_v58, %v2196_v19 }
 0xaee   :  { %v2198_v42 = vmul.f32 1.442695, %v2197_v60 }
 0xaf0   :  { %3212 = vpow2.f32 %v2198_v42 }
 0xaf6   :  { %v3213_v62 = vpop.eup %3212 }
 0xaf7   :  { %v2200_v2 = vsel %vm3933_vm3, %v3213_v62, 0.0 }
 0xaf8   :  { %v2201_v31 = vrot.slane %v2200_v2, 4 }
 0xafa   :  { %v2202_v53 = vadd.f32 %v2201_v31, %v2200_v2 }
 0xafc   :  { %v2203_v15 = vrot.slane %v2202_v53, 2 }
 0xafe   :  { %v2204_v39 = vadd.f32 %v2203_v15, %v2202_v53 }
 0xb00   :  { %v2205_v16 = vrot.slane %v2204_v39, 1 }
 0xb02   :  { %v2206_v52 = vadd.f32 %v2205_v16, %v2204_v39 }
 0xb04   :  { %v2207_v9 = vmax.f32 %v2206_v52, 1e-30 }
 0xb06   :  { %3214 = vrcp.f32 %v2207_v9  ;;  %v2219_v59 = vand.u32 2147483648, %v2207_v9  ;;  %v2217_v46 = vand.u32 2147483647, %v2207_v9  ;;  %vm2213_vm12 = vweird.f32 %v2207_v9 }
 0xb08   :  { %v2220_v11 = vor.u32 1.1754944e-38, %v2219_v59  ;;  %vm2218_vm3 = vcmp.eq.f32.partialorder %v2217_v46, 8.507059e+37  ;;  %v3162_v59 = vld [vmem:[#allocation2 + $0x64] sm:$0xf0] }
 0xb0c   :  { %v3215_v8 = vpop.eup %3214 }
 0xb0d   :  { %v2209_v13 = vmul.f32 %v3215_v8, %v2207_v9  ;;  %vm2214_vm11 = vweird.f32 %v3215_v8 }
 0xb0e   :  { %vm2215_vm13 = vmor %vm2213_vm12, %vm2214_vm11 }
 0xb0f   :  { %v2210_v29 = vsub.f32 1.0, %v2209_v13 }
 0xb11   :  { %v2211_v23 = vmul.f32 %v3215_v8, %v2210_v29  ;;  %v3039_v29 = vld [vmem:[#allocation2 + $0x60] sm:$0xf] }
 0xb13   :  { %v2212_v7 = vadd.f32 %v3215_v8, %v2211_v23 }
 0xb15   :  { %v2216_v56 = vsel %vm2215_vm13, %v3215_v8, %v2212_v7  ;;  %v3047_v8 = vld [vmem:[#allocation2 + $0x70] sm:$0xf]  ;;  %v3040_v7 = vor.u32 %v3162_v59, %v3039_v29 }
 0xb16   :  { %v2221_v55 = vsel %vm2218_vm3, %v2220_v11, %v2216_v56  ;;  %v3031_v11 = vld [vmem:[#allocation2 + $0x50] sm:$0xf] }
 0xb17   :  { %v2223_v17 = vmul.f32 %v2221_v55, %v2200_v2 }
 0xb19   :  { %v4330_v49 = vpack.c.bf16 %v2223_v17, %v2223_v17  ;;  %v3158_v17 = vld [vmem:[#allocation2 + $0x44] sm:$0xf0] }
 0xb1b   :  { %2225 = vxpose.xlu0.c.b16.start.end [1/1] (short) %v4330_v49, 128 }
 0xbc7   :  { %v2233_v48 = vpop.trf.xlu0 }
 0xbc8   :  { %2981 = vmatmul.msk.bf16.vlgmr.msra.gmra.mxu3 %vm591_vm2, %v2233_v48 }
 0xbd7   :  { %v2234_v4 = vpop.trf.xlu0 }
 0xbd8   :  { %2982 = vmatmul.msk.bf16.gmra.mxu3 %vm591_vm2, %v2234_v4 }
 0xbe7   :  { %v2235_v1 = vpop.trf.xlu0 }
 0xbe8   :  { %2983 = vmatmul.msk.bf16.gmra.mxu3 %vm591_vm2, %v2235_v1  ;;  %v3015_v1 = vld [vmem:[#allocation2 + $0x30] sm:$0xf] }
 0xbf7   :  { %v2236_v18 = vpop.trf.xlu0 }
 0xbf8   :  { %2984 = vmatmul.msk.bf16.gmra.mxu3 %vm591_vm2, %v2236_v18  ;;  %v3156_v18 = vld [vmem:[#allocation2 + $0x34] sm:$0xf0] }
 0xc07   :  { %v2237_v37 = vpop.trf.xlu0 }
 0xc08   :  { %2985 = vmatmul.msk.bf16.gmra.mxu3 %vm591_vm2, %v2237_v37  ;;  %v3016_v37 = vor.u32 %v3156_v18, %v3015_v1 }
 0xc17   :  { %v2238_v14 = vpop.trf.xlu0 }
 0xc18   :  { %2986 = vmatmul.msk.bf16.gmra.mxu3 %vm591_vm2, %v2238_v14 }
 0xc27   :  { %v2239_v63 = vpop.trf.xlu0 }
 0xc28   :  { %2987 = vmatmul.msk.bf16.gmra.mxu3 %vm591_vm2, %v2239_v63  ;;  %v3161_v63 = vld [vmem:[#allocation2 + $0x64] sm:$0xf] }
 0xc37   :  { %v2240_v33 = vpop.trf.xlu0 }
 0xc38   :  { %2988 = vmatmul.msk.bf16.gmra.mxu3 %vm591_vm2, %v2240_v33  ;;  %v3041_v33 = vld [vmem:[#allocation2 + $0x68] sm:$0xf0] }
 0xc4b   :  { %v2274_v26 = vpop.f32.mrf.mxu3 }
 0xc4c   :  { %v4342_v20 = vmul.f32 %v2274_v26, %v4072_v32  ;;  %v3159_v26 = vld [vmem:[#allocation2 + $0x54] sm:$0xf] }
 0xc53   :  { %v2276_v25 = vpop.f32.mrf.mxu3 }
 0xc54   :  { %v4345_v28 = vmul.f32 %v2276_v25, %v4083_v24  ;;  %v3033_v25 = vld [vmem:[#allocation2 + $0x58] sm:$0xf0] }
 0xc56   :  { %v2330_v43 = vpack.c.bf16 %v4345_v28, %v4342_v20  ;;  %v3154_v20 = vld [vmem:[#allocation2 + $0x24] sm:$0xf0]  ;;  %v3153_v28 = vld [vmem:[#allocation2 + $0x24] sm:$0xf] }
 0xc5b   :  { %v2279_v61 = vpop.f32.mrf.mxu3 }
 0xc5c   :  { %v2316_v58 = vmul.f32 %v2279_v61, %v4060_v54  ;;  %v3036_v61 = vor.u32 %v3159_v26, %v3033_v25 }
 0xc63   :  { %v2281_v36 = vpop.f32.mrf.mxu3 }
 0xc64   :  { %v2317_v41 = vmul.f32 %v2281_v36, %v4065_v0  ;;  %v3157_v36 = vld [vmem:[#allocation2 + $0x44] sm:$0xf] }
 0xc66   :  { %v2331_v27 = vpack.c.bf16 %v2317_v41, %v2316_v58  ;;  %v3025_v58 = vld [vmem:[#allocation2 + $0x48] sm:$0xf0] }
 0xc67   :  { %v3028_v41 = vor.u32 %v3157_v36, %v3025_v58 }
 0xc6b   :  { %v2284_v44 = vpop.f32.mrf.mxu3 }
 0xc6c   :  { %v2318_v10 = vmul.f32 %v2284_v44, %v4056_v47  ;;  %v3017_v44 = vld [vmem:[#allocation2 + $0x38] sm:$0xf0] }
 0xc73   :  { %v2286_v45 = vpop.f32.mrf.mxu3 }
 0xc74   :  { %v2319_v32 = vmul.f32 %v2286_v45, %v4058_v50 }
 0xc76   :  { %v2332_v21 = vpack.c.bf16 %v2319_v32, %v2318_v10  ;;  %v3007_v10 = vld [vmem:[#allocation2 + $0x20] sm:$0xf]  ;;  %v3009_v32 = vld [vmem:[#allocation2 + $0x28] sm:$0xf0] }
 0xc7b   :  { %v2289_v19 = vpop.f32.mrf.mxu3 }
 0xc7c   :  { %v2320_v60 = vmul.f32 %v2289_v19, %v4046_v34  ;;  %v3164_v34 = vld [vmem:[#allocation2 + $0x74] sm:$0xf0] }
 0xc7d   :  { %v3048_v13 = vor.u32 %v3164_v34, %v3047_v8  ;;  %v3152_v19 = vld [vmem:[#allocation2 + $0x14] sm:$0xf0]  ;;  %v3195_v34 = vld [vmem:[%s4400_s12 + $0x8] ss:$0 sm:$0xff] }
 0xc7f   :  { %2468 = vmatpush.bf16.msrb.mxu1 %v3048_v13 }
 0xc83   :  { %v2291_v24 = vpop.f32.mrf.mxu3  ;;  %2469 = vmatpush.bf16.msrb.mxu1 %v3040_v7 }
 0xc84   :  { %v2321_v42 = vmul.f32 %v2291_v24, %v4054_v22  ;;  %v3151_v24 = vld [vmem:[#allocation2 + $0x14] sm:$0xf] }
 0xc86   :  { %v2333_v62 = vpack.c.bf16 %v2321_v42, %v2320_v60  ;;  %v3001_v42 = vld [vmem:[#allocation2 + $0x18] sm:$0xf0] }
 0xc8b   :  { %v2294_v2 = vpop.f32.mrf.mxu3 }
 0xc8c   :  { %v2322_v48 = vmul.f32 %v2294_v2, %v4041_v30  ;;  %v3044_v30 = vor.u32 %v3161_v63, %v3041_v33  ;;  %v2991_v2 = vld [vmem:[#allocation2] sm:$0xf] }
 0xc8d   :  { %v3218_v63 = vld [vmem:[%s4388_s0 + $0x8] sm:$0xff] }
 0xc93   :  { %v2296_v31 = vpop.f32.mrf.mxu3 }
 0xc9b   :  { %v2299_v54 = vpop.f32.mrf.mxu3 }
 0xca3   :  { %v2301_v53 = vpop.f32.mrf.mxu3 }
 0xca4   :  { %v2325_v23 = vmul.f32 %v2301_v53, %v4037_v57 }
 0xcab   :  { %v2304_v0 = vpop.f32.mrf.mxu3 }
 0xcac   :  { %v2326_v22 = vmul.f32 %v2304_v0, %v4018_v40  ;;  %v3023_v40 = vld [vmem:[#allocation2 + $0x40] sm:$0xf]  ;;  %v2993_v0 = vld [vmem:[#allocation2 + $0x8] sm:$0xf0] }
 0xcad   :  { %v3024_v57 = vor.u32 %v3158_v17, %v3023_v40 }
 0xcb3   :  { %v2306_v15 = vpop.f32.mrf.mxu3 }
 0xcb4   :  { %v2327_v52 = vmul.f32 %v2306_v15, %v4025_v38  ;;  %v2323_v38 = vmul.f32 %v2296_v31, %v4043_v5  ;;  %v3049_v5 = vld [vmem:[#allocation2 + $0x78] sm:$0xf0]  ;;  %v3150_v31 = vld [vmem:[#allocation2 + $0x4] sm:$0xf0] }
 0xcb5   :  { %v2992_v53 = vor.u32 %v3150_v31, %v2991_v2 }
 0xcb6   :  { %v2336_v46 = vpack.c.bf16 %v2327_v52, %v2326_v22  ;;  %v2334_v4 = vpack.c.bf16 %v2323_v38, %v2322_v48 }
 0xcbb   :  { %v2309_v39 = vpop.f32.mrf.mxu3 }
 0xcbc   :  { %v2328_v47 = vmul.f32 %v2309_v39, %v4004_v6  ;;  %v3160_v6 = vld [vmem:[#allocation2 + $0x54] sm:$0xf0]  ;;  %v2357_v39 = vperm.slane %v4287_v3, 6 }
 0xcbd   :  { %v3032_v55 = vor.u32 %v3160_v6, %v3031_v11 }
 0xcbf   :  { %2470 = vmatpush.bf16.msrb.mxu1 %v3032_v55 }
 0xcc3   :  { %v2311_v16 = vpop.f32.mrf.mxu3  ;;  %2471 = vmatpush.bf16.msrb.mxu1 %v3024_v57 }
 0xcc4   :  { %v2329_v50 = vmul.f32 %v2311_v16, %v4008_v12  ;;  %v2324_v12 = vmul.f32 %v2299_v54, %v4031_v51  ;;  %v3163_v51 = vld [vmem:[#allocation2 + $0x74] sm:$0xf]  ;;  %v3149_v54 = vld [vmem:[#allocation2 + $0x4] sm:$0xf]  ;;  %v2354_v16 = vpop.permute.xlu1 %2353 }
 0xcc5   :  { %v3052_v14 = vor.u32 %v3163_v51, %v3049_v5  ;;  %v2996_v15 = vor.u32 %v3149_v54, %v2993_v0  ;;  %v3217_v51 = vld [vmem:[%s4388_s0] sm:$0xff] }
 0xcc6   :  { %v2337_v9 = vpack.c.bf16 %v2329_v50, %v2328_v47  ;;  %v2335_v56 = vpack.c.bf16 %v2325_v23, %v2324_v12  ;;  %v88_v23 = vld [vmem:[%s4401_s13] sm:$0x77] }
 0xcc7   :  { %2472 = vmatpush.bf16.msrb.mxu1 %v3016_v37  ;;  %v2383_v7 = vperm.slane %v88_v23, 4  ;;  %v2503_v38 = vperm.slane %v88_v23, 5  ;;  %v2510_v40 = vperm.slane %v88_v23, 2  ;;  %v2511_v17 = vperm.slane %v88_v23, 6 }
 0xcc8   :  { %2338 = vmatpush.bf16.msra.mxu0 %v2337_v9  ;;  %v2360_v9 = vperm.slane %v4287_v3, 7 }
 0xcc9   :  { %v2387_v3 = vperm.slane %v2383_v7, 0  ;;  %v2507_v1 = vperm.slane %v2503_v38, 1 }
 0xccc   :  { %2339 = vmatpush.bf16.msra.mxu0 %v2336_v46  ;;  %v2382_v46 = vperm.slane %v88_v23, 0 }
 0xcce   :  { %v2386_v11 = vperm.slane %v2382_v46, 0 }
 0xcd0   :  { %2340 = vmatpush.bf16.msra.mxu0 %v2335_v56 }
 0xcd4   :  { %2341 = vmatpush.bf16.msra.mxu0 %v2334_v4 }
 0xcd8   :  { %2342 = vmatpush.bf16.msra.mxu0 %v2333_v62  ;;  %v3004_v62 = vor.u32 %v3151_v24, %v3001_v42 }
 0xcdc   :  { %2343 = vmatpush.bf16.msra.mxu0 %v2332_v21  ;;  %v3012_v21 = vor.u32 %v3153_v28, %v3009_v32 }
 0xce0   :  { %2344 = vmatpush.bf16.msra.mxu0 %v2331_v27  ;;  %v3155_v27 = vld [vmem:[#allocation2 + $0x34] sm:$0xf] }
 0xce1   :  { %v3020_v45 = vor.u32 %v3155_v27, %v3017_v44 }
 0xce4   :  { %2345 = vmatpush.bf16.msra.mxu0 %v2330_v43  ;;  %v3008_v43 = vor.u32 %v3154_v20, %v3007_v10 }
 0xce6   :  { %2473 = vmatpush.bf16.msrb.mxu1 %v3008_v43 }
 0xce7   :  { %2346 = vmatmul.bf16.vlgmr.msra.gmra.mxu0 %v4330_v49  ;;  %v2999_v49 = vld [vmem:[#allocation2 + $0x10] sm:$0xf] }
 0xce8   :  { %2481 = vmatpush.bf16.msrb.mxu0 %v3052_v14  ;;  %v3000_v60 = vor.u32 %v3152_v19, %v2999_v49  ;;  %v2514_v14 = vperm.slane %v2510_v40, 2 }
 0xcea   :  { %2474 = vmatpush.bf16.msrb.mxu1 %v3000_v60 }
 0xcec   :  { %2482 = vmatpush.bf16.msrb.mxu0 %v3044_v30  ;;  %v2515_v30 = vperm.slane %v2511_v17, 2 }
 0xcee   :  { %2475 = vmatpush.bf16.msrb.mxu1 %v2992_v53 }
 0xcf0   :  { %2483 = vmatpush.bf16.msrb.mxu0 %v3036_v61 }
 0xcf4   :  { %2484 = vmatpush.bf16.msrb.mxu0 %v3028_v41 }
 0xcf8   :  { %2485 = vmatpush.bf16.msrb.mxu0 %v3020_v45 }
 0xcfc   :  { %2486 = vmatpush.bf16.msrb.mxu0 %v3012_v21 }
 0xd00   :  { %2487 = vmatpush.bf16.msrb.mxu0 %v3004_v62 }
 0xd04   :  { %2488 = vmatpush.bf16.msrb.mxu0 %v2996_v15 }
 0xd64   :  { %v2347_v47 = vpop.f32.mrf.mxu0 }
 0xd65   :  { %v2356_v50 = vmul.f32 %v2354_v16, %v2347_v47 }
 0xd67   :  { %v2358_v52 = vadd.f32 %v2357_v39, %v2356_v50 }
 0xd69   :  { %v2359_v8 = vadd.f32 %v2358_v52, %v4299_v35  ;;  %v2502_v35 = vperm.slane %v88_v23, 1 }
 0xd6b   :  { %v2361_v22 = vmul.f32 %v2360_v9, %v2359_v8  ;;  %v2506_v57 = vperm.slane %v2502_v35, 1 }
 0xd6c   :  { %v2349_v13 = vpop.f32.mrf.mxu0 }
 0xd6d   :  { %v2363_v29 = vadd.f32 %v3195_v34, %v2361_v22 }
 0xd6f   :  { %v2364_v59 = vpack.c.bf16 %v2363_v29, %v2363_v29 }
 0xd71   :  { %2476 = vmatmul.bf16.vlgmr.msrb.gmra.mxu1 %v2364_v59  ;;  %2489 = vmatmul.bf16.vlgmr.msrb.gmra.mxu0 %v2364_v59 }
 0xdee   :  { %v2477_v6 = vpop.f32.mrf.mxu1  ;;  %v2490_v12 = vpop.f32.mrf.mxu0 }
 0xdef   :  { %v2478_v56 = vadd.f32 %v2477_v6, %v2386_v11  ;;  %v2491_v55 = vadd.f32 %v2490_v12, %v2387_v3 }
 0xdf1   :  { %vm2494_vm2 = vcmp.ge.f32.partialorder %v2478_v56, 0.0  ;;  %v2496_v48 = vmul.f32 0.2, %v2478_v56  ;;  %vm2495_vm14 = vcmp.ge.f32.partialorder %v2491_v55, 0.0  ;;  %v2497_v4 = vmul.f32 0.2, %v2491_v55 }
 0xdf3   :  { %v2498_v18 = vsel %vm2494_vm2, %v2478_v56, %v2496_v48  ;;  %v2499_v37 = vsel %vm2495_vm14, %v2491_v55, %v2497_v4 }
 0xdf4   :  { %v2500_v5 = vadd.f32 %v3217_v51, %v2498_v18  ;;  %v2501_v33 = vadd.f32 %v3218_v63, %v2499_v37 }
 0xdf6   :  { %v2508_v26 = vmul.f32 %v2506_v57, %v2500_v5  ;;  %v2509_v25 = vmul.f32 %v2507_v1, %v2501_v33  ;;  %v2479_v61 = vpop.f32.mrf.mxu1  ;;  %v2492_v36 = vpop.f32.mrf.mxu0 }
 0xdf8   :  { %v2516_v58 = vadd.f32 %v2514_v14, %v2508_v26  ;;  %v2517_v41 = vadd.f32 %v2515_v30, %v2509_v25 }
 0xdfa   :  { %2518 = vst [vmem:[%s4402_s14] sm:$0xff] %v2516_v58 }
 0xdfb   :  { %2519 = vst [vmem:[%s4402_s14 + $0x8] sm:$0xff] %v2517_v41 }
 0xdfc   :  { %2524 = vsyncpa [#allocation3], 1 }

</bundles_post_ra>
